<compile_context>
chip_gen: v7x
topology: tpu7x:2x2x1
jax: 0.10.0
libtpu: 0.0.40
codegen_flags: <defaults>
</compile_context>

<pallas_src>
import jax
import jax.numpy as jnp
from jax.experimental import pallas as pl
from jax.experimental.pallas import tpu as pltpu

H = 4  # number of GCN heads (fixed by the module)


def graph_module_kernel(x_ref, a1_ref, a4_ref,
                        w1_ref, b1_ref, w2_ref, b2_ref,
                        ln_a_ref, ln_b_ref,
                        wf1_ref, bf1_ref, wf2_ref, bf2_ref,
                        out_ref):
    TB, K, indim = x_ref.shape
    outdim = out_ref.shape[-1]
    N = TB * K

    # Flatten the TB-batch tile to (TB*K, feature) rows for every weight matmul.
    x = x_ref[...].reshape(N, indim)                 # (N, indim)
    a1 = a1_ref[...].astype(jnp.float32)             # (TB, K, K)  in-kernel cast
    a4 = a4_ref[...].astype(jnp.float32)             # (TB, K, K)

    w1 = w1_ref[...]                                 # (indim, 4*hiddim), heads concat
    b1 = b1_ref[...]                                 # (1, 4*hiddim)
    w2 = w2_ref[...]                                 # (4*hiddim, outdim), block-diag
    b2 = b2_ref[...]                                 # (1, outdim)

    four_hid = w1.shape[-1]
    half_hid = four_hid // 2                         # heads {0,1} | heads {2,3}
    half_out = outdim // 2

    # ---- fused 4-head GCN layer 1:  relu(A @ (X W1) + b1) ----
    s = jnp.dot(x, w1, preferred_element_type=jnp.float32)       # (N, 4*hiddim)
    s = s.reshape(TB, K, four_hid)
    as1 = jnp.einsum("bij,bjf->bif", a1, s[..., :half_hid],
                     preferred_element_type=jnp.float32)
    as4 = jnp.einsum("bij,bjf->bif", a4, s[..., half_hid:],
                     preferred_element_type=jnp.float32)
    h1 = jnp.concatenate([as1, as4], axis=-1).reshape(N, four_hid)
    h1 = jnp.maximum(h1 + b1, 0.0)
    # dropout(p=0.3) is identity in eval mode.

    # ---- fused 4-head GCN layer 2:  A @ (h1 W2) + b2  (W2 packed block-diagonal) ----
    s2 = jnp.dot(h1, w2, preferred_element_type=jnp.float32)     # (N, outdim)
    s2 = s2.reshape(TB, K, outdim)
    o1 = jnp.einsum("bij,bjf->bif", a1, s2[..., :half_out],
                    preferred_element_type=jnp.float32)
    o4 = jnp.einsum("bij,bjf->bif", a4, s2[..., half_out:],
                    preferred_element_type=jnp.float32)
    g = jnp.concatenate([o1, o4], axis=-1).reshape(N, outdim) + b2   # (N, outdim)

    # ---- LayerNorm (torch unbiased std, eps added to std) + input residual ----
    mean = jnp.mean(g, axis=-1, keepdims=True)
    var = jnp.sum((g - mean) ** 2, axis=-1, keepdims=True) / (outdim - 1)
    # exact reciprocal (approx=True was considered but kept exact for strict 1e-4 parity)
    inv = pl.reciprocal(jnp.sqrt(var) + 1e-6, approx=False)
    g = ln_a_ref[...] * (g - mean) * inv + ln_b_ref[...]
    g = g + x                                        # requires outdim == indim

    # ---- PositionwiseFeedForward: W2(relu(W1 g + b1)) + b2, then residual ----
    hff = jnp.maximum(
        jnp.dot(g, wf1_ref[...], preferred_element_type=jnp.float32) + bf1_ref[...],
        0.0)
    ff = jnp.dot(hff, wf2_ref[...], preferred_element_type=jnp.float32) + bf2_ref[...]

    out_ref[...] = (ff + g).reshape(TB, K, outdim)


def _pack_head_params(params):
    """Concatenate per-head GCN weights so the 4 heads run as wide fused matmuls."""
    w1 = params["w1"]    # (H, indim, hiddim)
    b1 = params["b1"]    # (H, 1, hiddim)
    w2 = params["w2"]    # (H, hiddim, d_k)
    b2 = params["b2"]    # (H, 1, d_k)
    nh, _, hiddim = w1.shape
    d_k = w2.shape[-1]
    w1_all = jnp.concatenate([w1[h] for h in range(nh)], axis=-1)    # (indim, H*hiddim)
    b1_all = jnp.concatenate([b1[h] for h in range(nh)], axis=-1)    # (1, H*hiddim)
    b2_all = jnp.concatenate([b2[h] for h in range(nh)], axis=-1)    # (1, H*d_k)
    w2_block = jnp.zeros((nh * hiddim, nh * d_k), w2.dtype)          # block-diagonal
    for h in range(nh):
        w2_block = w2_block.at[h * hiddim:(h + 1) * hiddim,
                               h * d_k:(h + 1) * d_k].set(w2[h])
    return w1_all, b1_all, w2_block, b2_all


def graph_module_forward(graph_nodes, graph, params, *, target_rows=256):
    """graph_nodes: (B, K, indim) f32; graph: (B, 5, K, K) any numeric dtype.

    Returns (adj, graph_encode_features), mirroring the PyTorch module.
    """
    # PyTorch: if batch dims mismatch, graph_nodes arrives (K, B, indim) -> transpose.
    if graph_nodes.shape[0] != graph.shape[0]:
        graph_nodes = jnp.swapaxes(graph_nodes, 0, 1)

    B, K, indim = graph_nodes.shape
    outdim = params["wf2"].shape[-1]
    assert outdim == indim, "residual `g + graph_nodes` requires outdim == indim"
    assert outdim % H == 0, "outdim must be divisible by the number of heads"

    # Only adjacency channels 1 and 4 are used; keep original dtype (cast in-kernel).
    a1 = graph[:, 1]
    a4 = graph[:, 4]

    w1_all, b1_all, w2_block, b2_all = _pack_head_params(params)

    # Fold TB batch elements (TB*K matmul rows) into each grid step (~128-256 rows).
    TB = max(1, min(B, max(1, target_rows // K)))
    Bp = ((B + TB - 1) // TB) * TB
    if Bp != B:
        pad = Bp - B
        graph_nodes = jnp.concatenate(
            [graph_nodes, jnp.zeros((pad, K, indim), graph_nodes.dtype)], axis=0)
        zadj = jnp.zeros((pad, K, K), a1.dtype)
        a1 = jnp.concatenate([a1, zadj], axis=0)
        a4 = jnp.concatenate([a4, zadj], axis=0)

    full = lambda arr: pl.BlockSpec(arr.shape, lambda b: (0,) * arr.ndim)

    out = pl.pallas_call(
        graph_module_kernel,
        out_shape=jax.ShapeDtypeStruct((Bp, K, outdim), jnp.float32),
        grid_spec=pltpu.PrefetchScalarGridSpec(
            num_scalar_prefetch=0,
            grid=(Bp // TB,),
            in_specs=[
                pl.BlockSpec((TB, K, indim), lambda b: (b, 0, 0)),   # graph_nodes tile
                pl.BlockSpec((TB, K, K), lambda b: (b, 0, 0)),       # graph[:, 1] tile
                pl.BlockSpec((TB, K, K), lambda b: (b, 0, 0)),       # graph[:, 4] tile
                full(w1_all), full(b1_all), full(w2_block), full(b2_all),
                full(params["ln_a"]), full(params["ln_b"]),
                full(params["wf1"]), full(params["bf1"]),
                full(params["wf2"]), full(params["bf2"]),
            ],
            out_specs=pl.BlockSpec((TB, K, outdim), lambda b: (b, 0, 0)),
        ),
        compiler_params=pltpu.CompilerParams(dimension_semantics=("parallel",)),
    )(graph_nodes, a1, a4,
      w1_all, b1_all, w2_block, b2_all,
      params["ln_a"], params["ln_b"],
      params["wf1"], params["bf1"], params["wf2"], params["bf2"])

    if Bp != B:
        out = out[:B]

    adj = graph.astype(jnp.float32)   # the module returns the f32 adjacency stack
    return adj, out


def reference_forward(graph_nodes, graph, params):
    """Pure-JAX reference mirroring the PyTorch semantics (eval mode)."""
    adj = graph.astype(jnp.float32)
    adjs = [adj[:, 1], adj[:, 1], adj[:, 4], adj[:, 4]]
    feats = []
    for h in range(H):
        s = graph_nodes @ params["w1"][h]
        h1 = jax.nn.relu(jnp.einsum("bkj,bjd->bkd", adjs[h], s) + params["b1"][h])
        s2 = h1 @ params["w2"][h]
        o = jnp.einsum("bkj,bjd->bkd", adjs[h], s2) + params["b2"][h]
        feats.append(o)
    g = jnp.concatenate(feats, axis=-1)
    d = g.shape[-1]
    mean = jnp.mean(g, axis=-1, keepdims=True)
    std = jnp.sqrt(jnp.sum((g - mean) ** 2, axis=-1, keepdims=True) / (d - 1))
    g = params["ln_a"] * (g - mean) / (std + 1e-6) + params["ln_b"]
    g = g + graph_nodes
    ff = jax.nn.relu(g @ params["wf1"] + params["bf1"]) @ params["wf2"] + params["bf2"]
    return adj, ff + g


def make_params(key, indim, hiddim, outdim):
    d_k = outdim // H
    ks = jax.random.split(key, 8)
    scale = 0.1
    params = {
        "w1": scale * jax.random.normal(ks[0], (H, indim, hiddim), jnp.float32),
        "b1": scale * jax.random.normal(ks[1], (H, 1, hiddim), jnp.float32),
        "w2": scale * jax.random.normal(ks[2], (H, hiddim, d_k), jnp.float32),
        "b2": scale * jax.random.normal(ks[3], (H, 1, d_k), jnp.float32),
        "ln_a": jnp.ones((1, outdim), jnp.float32),
        "ln_b": jnp.zeros((1, outdim), jnp.float32),
        "wf1": scale * jax.random.normal(ks[4], (indim, hiddim), jnp.float32),
        "bf1": scale * jax.random.normal(ks[5], (1, hiddim), jnp.float32),
        "wf2": scale * jax.random.normal(ks[6], (hiddim, outdim), jnp.float32),
        "bf2": scale * jax.random.normal(ks[7], (1, outdim), jnp.float32),
    }
    return params


if __name__ == "__main__":
    # Small shapes consistent with the module; B*K = 128 rows fills one MXU pass.
    B, K, indim, hiddim, outdim = 16, 8, 32, 32, 32   # outdim == indim (residual add)

    key = jax.random.PRNGKey(0)
    k_x, k_g, k_p = jax.random.split(key, 3)

    graph_nodes = jax.random.normal(k_x, (B, K, indim), jnp.float32)
    # graph: (B, 5, K, K) binary adjacency stack (the module only uses slices 1 and 4)
    graph = (jax.random.uniform(k_g, (B, 5, K, K)) > 0.5).astype(jnp.int32)

    params = make_params(k_p, indim, hiddim, outdim)

    adj_out, enc = graph_module_forward(graph_nodes, graph, params)
    enc = jax.block_until_ready(enc)

    _, enc_ref = reference_forward(graph_nodes, graph, params)
    assert jnp.allclose(enc, enc_ref, atol=1e-4, rtol=1e-4), "mismatch vs reference"

    print("KERNEL_OK")
</pallas_src>

<mosaic_0001>
module attributes {stable_mosaic.version = 11 : i64} {
  func.func @graph_module_kernel(%arg0: i32, %arg1: memref<16x8x32xf32, #tpu.memory_space<vmem>>, %arg2: memref<16x8x8xi32, #tpu.memory_space<vmem>>, %arg3: memref<16x8x8xi32, #tpu.memory_space<vmem>>, %arg4: memref<32x128xf32, #tpu.memory_space<vmem>>, %arg5: memref<1x128xf32, #tpu.memory_space<vmem>>, %arg6: memref<128x32xf32, #tpu.memory_space<vmem>>, %arg7: memref<1x32xf32, #tpu.memory_space<vmem>>, %arg8: memref<1x32xf32, #tpu.memory_space<vmem>>, %arg9: memref<1x32xf32, #tpu.memory_space<vmem>>, %arg10: memref<32x32xf32, #tpu.memory_space<vmem>>, %arg11: memref<1x32xf32, #tpu.memory_space<vmem>>, %arg12: memref<32x32xf32, #tpu.memory_space<vmem>>, %arg13: memref<1x32xf32, #tpu.memory_space<vmem>>, %arg14: memref<16x8x32xf32, #tpu.memory_space<vmem>>) attributes {dimension_semantics = [#tpu.dimension_semantics<parallel>], iteration_bounds = array<i64: 1>, scalar_prefetch = 0 : i64, scratch_operands = 0 : i64, tpu.core_type = #tpu.core_type<tc>, window_params = [{transform_indices = @transform_0, window_bounds = array<i64: 16, 8, 32>}, {transform_indices = @transform_1, window_bounds = array<i64: 16, 8, 8>}, {transform_indices = @transform_2, window_bounds = array<i64: 16, 8, 8>}, {pipeline_mode = #tpu.pipeline_mode<synchronous>, transform_indices = @transform_3, window_bounds = array<i64: 32, 128>}, {pipeline_mode = #tpu.pipeline_mode<synchronous>, transform_indices = @transform_4, window_bounds = array<i64: 1, 128>}, {pipeline_mode = #tpu.pipeline_mode<synchronous>, transform_indices = @transform_5, window_bounds = array<i64: 128, 32>}, {pipeline_mode = #tpu.pipeline_mode<synchronous>, transform_indices = @transform_6, window_bounds = array<i64: 1, 32>}, {pipeline_mode = #tpu.pipeline_mode<synchronous>, transform_indices = @transform_7, window_bounds = array<i64: 1, 32>}, {pipeline_mode = #tpu.pipeline_mode<synchronous>, transform_indices = @transform_8, window_bounds = array<i64: 1, 32>}, {pipeline_mode = #tpu.pipeline_mode<synchronous>, transform_indices = @transform_9, window_bounds = array<i64: 32, 32>}, {pipeline_mode = #tpu.pipeline_mode<synchronous>, transform_indices = @transform_10, window_bounds = array<i64: 1, 32>}, {pipeline_mode = #tpu.pipeline_mode<synchronous>, transform_indices = @transform_11, window_bounds = array<i64: 32, 32>}, {pipeline_mode = #tpu.pipeline_mode<synchronous>, transform_indices = @transform_12, window_bounds = array<i64: 1, 32>}, {transform_indices = @transform_13, window_bounds = array<i64: 16, 8, 32>}]} {
    %c0 = arith.constant 0 : index
    %c0_0 = arith.constant 0 : index
    %c0_1 = arith.constant 0 : index
    %0 = vector.load %arg1[%c0, %c0_0, %c0_1] : memref<16x8x32xf32, #tpu.memory_space<vmem>>, vector<16x8x32xf32>
    %1 = vector.shape_cast %0 : vector<16x8x32xf32> to vector<128x32xf32>
    %c0_2 = arith.constant 0 : index
    %c0_3 = arith.constant 0 : index
    %c0_4 = arith.constant 0 : index
    %2 = vector.load %arg2[%c0_2, %c0_3, %c0_4] : memref<16x8x8xi32, #tpu.memory_space<vmem>>, vector<16x8x8xi32>
    %3 = arith.sitofp %2 : vector<16x8x8xi32> to vector<16x8x8xf32>
    %c0_5 = arith.constant 0 : index
    %c0_6 = arith.constant 0 : index
    %c0_7 = arith.constant 0 : index
    %4 = vector.load %arg3[%c0_5, %c0_6, %c0_7] : memref<16x8x8xi32, #tpu.memory_space<vmem>>, vector<16x8x8xi32>
    %5 = arith.sitofp %4 : vector<16x8x8xi32> to vector<16x8x8xf32>
    %c0_8 = arith.constant 0 : index
    %c0_9 = arith.constant 0 : index
    %6 = vector.load %arg4[%c0_8, %c0_9] : memref<32x128xf32, #tpu.memory_space<vmem>>, vector<32x128xf32>
    %c0_10 = arith.constant 0 : index
    %c0_11 = arith.constant 0 : index
    %7 = vector.load %arg5[%c0_10, %c0_11] : memref<1x128xf32, #tpu.memory_space<vmem>>, vector<1x128xf32>
    %c0_12 = arith.constant 0 : index
    %c0_13 = arith.constant 0 : index
    %8 = vector.load %arg6[%c0_12, %c0_13] : memref<128x32xf32, #tpu.memory_space<vmem>>, vector<128x32xf32>
    %c0_14 = arith.constant 0 : index
    %c0_15 = arith.constant 0 : index
    %9 = vector.load %arg7[%c0_14, %c0_15] : memref<1x32xf32, #tpu.memory_space<vmem>>, vector<1x32xf32>
    %cst = arith.constant dense<0.000000e+00> : vector<128x128xf32>
    %10 = tpu.matmul %1, %6, %cst {dimension_numbers = #tpu.dot_dimension_numbers<[1], [0], [0], [1], [0, 0, 1, 1], [], []>} : vector<128x32xf32>, vector<32x128xf32>, vector<128x128xf32> -> vector<128x128xf32>
    %11 = vector.shape_cast %10 : vector<128x128xf32> to vector<16x8x128xf32>
    %12 = vector.extract_strided_slice %11 {offsets = [0, 0, 0], sizes = [16, 8, 64], strides = [1, 1, 1]} : vector<16x8x128xf32> to vector<16x8x64xf32>
    "tpu.trace_start"() <{level = 10 : i32, message = "bij,bjf->bif"}> : () -> ()
    %cst_16 = arith.constant dense<0.000000e+00> : vector<16x8x64xf32>
    %13 = tpu.matmul %3, %12, %cst_16 {dimension_numbers = #tpu.dot_dimension_numbers<[2], [1], [1], [2], [0, 0, 0, 1, 1, 2], [0], [0]>} : vector<16x8x8xf32>, vector<16x8x64xf32>, vector<16x8x64xf32> -> vector<16x8x64xf32>
    "tpu.trace_stop"() : () -> ()
    %14 = vector.extract_strided_slice %11 {offsets = [0, 0, 64], sizes = [16, 8, 64], strides = [1, 1, 1]} : vector<16x8x128xf32> to vector<16x8x64xf32>
    "tpu.trace_start"() <{level = 10 : i32, message = "bij,bjf->bif"}> : () -> ()
    %cst_17 = arith.constant dense<0.000000e+00> : vector<16x8x64xf32>
    %15 = tpu.matmul %5, %14, %cst_17 {dimension_numbers = #tpu.dot_dimension_numbers<[2], [1], [1], [2], [0, 0, 0, 1, 1, 2], [0], [0]>} : vector<16x8x8xf32>, vector<16x8x64xf32>, vector<16x8x64xf32> -> vector<16x8x64xf32>
    "tpu.trace_stop"() : () -> ()
    %16 = tpu.concatenate %13, %15 in 2 : vector<16x8x64xf32>, vector<16x8x64xf32> -> vector<16x8x128xf32>
    %17 = vector.shape_cast %16 : vector<16x8x128xf32> to vector<128x128xf32>
    %18 = vector.broadcast %7 : vector<1x128xf32> to vector<128x128xf32>
    %19 = arith.addf %17, %18 : vector<128x128xf32>
    %cst_18 = arith.constant 0.000000e+00 : f32
    %20 = vector.broadcast %cst_18 : f32 to vector<128x128xf32>
    %21 = arith.maximumf %19, %20 : vector<128x128xf32>
    %cst_19 = arith.constant dense<0.000000e+00> : vector<128x32xf32>
    %22 = tpu.matmul %21, %8, %cst_19 {dimension_numbers = #tpu.dot_dimension_numbers<[1], [0], [0], [1], [0, 0, 1, 1], [], []>} : vector<128x128xf32>, vector<128x32xf32>, vector<128x32xf32> -> vector<128x32xf32>
    %23 = vector.shape_cast %22 : vector<128x32xf32> to vector<16x8x32xf32>
    %24 = vector.extract_strided_slice %23 {offsets = [0, 0, 0], sizes = [16, 8, 16], strides = [1, 1, 1]} : vector<16x8x32xf32> to vector<16x8x16xf32>
    "tpu.trace_start"() <{level = 10 : i32, message = "bij,bjf->bif"}> : () -> ()
    %cst_20 = arith.constant dense<0.000000e+00> : vector<16x8x16xf32>
    %25 = tpu.matmul %3, %24, %cst_20 {dimension_numbers = #tpu.dot_dimension_numbers<[2], [1], [1], [2], [0, 0, 0, 1, 1, 2], [0], [0]>} : vector<16x8x8xf32>, vector<16x8x16xf32>, vector<16x8x16xf32> -> vector<16x8x16xf32>
    "tpu.trace_stop"() : () -> ()
    %26 = vector.extract_strided_slice %23 {offsets = [0, 0, 16], sizes = [16, 8, 16], strides = [1, 1, 1]} : vector<16x8x32xf32> to vector<16x8x16xf32>
    "tpu.trace_start"() <{level = 10 : i32, message = "bij,bjf->bif"}> : () -> ()
    %cst_21 = arith.constant dense<0.000000e+00> : vector<16x8x16xf32>
    %27 = tpu.matmul %5, %26, %cst_21 {dimension_numbers = #tpu.dot_dimension_numbers<[2], [1], [1], [2], [0, 0, 0, 1, 1, 2], [0], [0]>} : vector<16x8x8xf32>, vector<16x8x16xf32>, vector<16x8x16xf32> -> vector<16x8x16xf32>
    "tpu.trace_stop"() : () -> ()
    %28 = tpu.concatenate %25, %27 in 2 : vector<16x8x16xf32>, vector<16x8x16xf32> -> vector<16x8x32xf32>
    %29 = vector.shape_cast %28 : vector<16x8x32xf32> to vector<128x32xf32>
    %30 = vector.broadcast %9 : vector<1x32xf32> to vector<128x32xf32>
    %31 = arith.addf %29, %30 : vector<128x32xf32>
    %cst_22 = arith.constant dense<0.000000e+00> : vector<128xf32>
    %32 = vector.multi_reduction <add>, %31, %cst_22 [1] : vector<128x32xf32> to vector<128xf32>
    %33 = vector.shape_cast %32 : vector<128xf32> to vector<128x1xf32>
    %cst_23 = arith.constant 3.200000e+01 : f32
    %34 = vector.broadcast %cst_23 : f32 to vector<128x1xf32>
    %35 = arith.divf %33, %34 : vector<128x1xf32>
    %36 = vector.broadcast %35 : vector<128x1xf32> to vector<128x32xf32>
    %37 = arith.subf %31, %36 : vector<128x32xf32>
    %38 = arith.mulf %37, %37 : vector<128x32xf32>
    %cst_24 = arith.constant dense<0.000000e+00> : vector<128xf32>
    %39 = vector.multi_reduction <add>, %38, %cst_24 [1] : vector<128x32xf32> to vector<128xf32>
    %40 = vector.shape_cast %39 : vector<128xf32> to vector<128x1xf32>
    %cst_25 = arith.constant 3.100000e+01 : f32
    %41 = vector.broadcast %cst_25 : f32 to vector<128x1xf32>
    %42 = arith.divf %40, %41 : vector<128x1xf32>
    %43 = math.sqrt %42 : vector<128x1xf32>
    %cst_26 = arith.constant 9.99999997E-7 : f32
    %44 = vector.broadcast %cst_26 : f32 to vector<128x1xf32>
    %45 = arith.addf %43, %44 : vector<128x1xf32>
    %46 = tpu.reciprocal %45 : vector<128x1xf32> -> vector<128x1xf32>
    %c0_27 = arith.constant 0 : index
    %c0_28 = arith.constant 0 : index
    %47 = vector.load %arg8[%c0_27, %c0_28] : memref<1x32xf32, #tpu.memory_space<vmem>>, vector<1x32xf32>
    %48 = vector.broadcast %35 : vector<128x1xf32> to vector<128x32xf32>
    %49 = arith.subf %31, %48 : vector<128x32xf32>
    %50 = vector.broadcast %47 : vector<1x32xf32> to vector<128x32xf32>
    %51 = arith.mulf %50, %49 : vector<128x32xf32>
    %52 = vector.broadcast %46 : vector<128x1xf32> to vector<128x32xf32>
    %53 = arith.mulf %51, %52 : vector<128x32xf32>
    %c0_29 = arith.constant 0 : index
    %c0_30 = arith.constant 0 : index
    %54 = vector.load %arg9[%c0_29, %c0_30] : memref<1x32xf32, #tpu.memory_space<vmem>>, vector<1x32xf32>
    %55 = vector.broadcast %54 : vector<1x32xf32> to vector<128x32xf32>
    %56 = arith.addf %53, %55 : vector<128x32xf32>
    %57 = arith.addf %56, %1 : vector<128x32xf32>
    %c0_31 = arith.constant 0 : index
    %c0_32 = arith.constant 0 : index
    %58 = vector.load %arg10[%c0_31, %c0_32] : memref<32x32xf32, #tpu.memory_space<vmem>>, vector<32x32xf32>
    %cst_33 = arith.constant dense<0.000000e+00> : vector<128x32xf32>
    %59 = tpu.matmul %57, %58, %cst_33 {dimension_numbers = #tpu.dot_dimension_numbers<[1], [0], [0], [1], [0, 0, 1, 1], [], []>} : vector<128x32xf32>, vector<32x32xf32>, vector<128x32xf32> -> vector<128x32xf32>
    %c0_34 = arith.constant 0 : index
    %c0_35 = arith.constant 0 : index
    %60 = vector.load %arg11[%c0_34, %c0_35] : memref<1x32xf32, #tpu.memory_space<vmem>>, vector<1x32xf32>
    %61 = vector.broadcast %60 : vector<1x32xf32> to vector<128x32xf32>
    %62 = arith.addf %59, %61 : vector<128x32xf32>
    %cst_36 = arith.constant 0.000000e+00 : f32
    %63 = vector.broadcast %cst_36 : f32 to vector<128x32xf32>
    %64 = arith.maximumf %62, %63 : vector<128x32xf32>
    %c0_37 = arith.constant 0 : index
    %c0_38 = arith.constant 0 : index
    %65 = vector.load %arg12[%c0_37, %c0_38] : memref<32x32xf32, #tpu.memory_space<vmem>>, vector<32x32xf32>
    %cst_39 = arith.constant dense<0.000000e+00> : vector<128x32xf32>
    %66 = tpu.matmul %64, %65, %cst_39 {dimension_numbers = #tpu.dot_dimension_numbers<[1], [0], [0], [1], [0, 0, 1, 1], [], []>} : vector<128x32xf32>, vector<32x32xf32>, vector<128x32xf32> -> vector<128x32xf32>
    %c0_40 = arith.constant 0 : index
    %c0_41 = arith.constant 0 : index
    %67 = vector.load %arg13[%c0_40, %c0_41] : memref<1x32xf32, #tpu.memory_space<vmem>>, vector<1x32xf32>
    %68 = vector.broadcast %67 : vector<1x32xf32> to vector<128x32xf32>
    %69 = arith.addf %66, %68 : vector<128x32xf32>
    %70 = arith.addf %69, %57 : vector<128x32xf32>
    %71 = vector.shape_cast %70 : vector<128x32xf32> to vector<16x8x32xf32>
    %c0_42 = arith.constant 0 : index
    %c0_43 = arith.constant 0 : index
    %c0_44 = arith.constant 0 : index
    %72 = vector.load %arg14[%c0_42, %c0_43, %c0_44] : memref<16x8x32xf32, #tpu.memory_space<vmem>>, vector<16x8x32xf32>
    tpu.vector_store %arg14[%c0_42, %c0_43, %c0_44], %71 {strides = array<i32>} : memref<16x8x32xf32, #tpu.memory_space<vmem>>, vector<16x8x32xf32>,
    return
  }
  func.func @transform_0(%arg0: i32) -> (i32, i32, i32) {
    %c0_i32 = arith.constant 0 : i32
    %c0_i32_0 = arith.constant 0 : i32
    %c0_i32_1 = arith.constant 0 : i32
    return %arg0, %c0_i32, %c0_i32_0 : i32, i32, i32
  }
  func.func @transform_1(%arg0: i32) -> (i32, i32, i32) {
    %c0_i32 = arith.constant 0 : i32
    %c0_i32_0 = arith.constant 0 : i32
    %c0_i32_1 = arith.constant 0 : i32
    return %arg0, %c0_i32, %c0_i32_0 : i32, i32, i32
  }
  func.func @transform_2(%arg0: i32) -> (i32, i32, i32) {
    %c0_i32 = arith.constant 0 : i32
    %c0_i32_0 = arith.constant 0 : i32
    %c0_i32_1 = arith.constant 0 : i32
    return %arg0, %c0_i32, %c0_i32_0 : i32, i32, i32
  }
  func.func @transform_3(%arg0: i32) -> (i32, i32) {
    %c0_i32 = arith.constant 0 : i32
    %c0_i32_0 = arith.constant 0 : i32
    %c0_i32_1 = arith.constant 0 : i32
    return %c0_i32, %c0_i32_0 : i32, i32
  }
  func.func @transform_4(%arg0: i32) -> (i32, i32) {
    %c0_i32 = arith.constant 0 : i32
    %c0_i32_0 = arith.constant 0 : i32
    %c0_i32_1 = arith.constant 0 : i32
    return %c0_i32, %c0_i32_0 : i32, i32
  }
  func.func @transform_5(%arg0: i32) -> (i32, i32) {
    %c0_i32 = arith.constant 0 : i32
    %c0_i32_0 = arith.constant 0 : i32
    %c0_i32_1 = arith.constant 0 : i32
    return %c0_i32, %c0_i32_0 : i32, i32
  }
  func.func @transform_6(%arg0: i32) -> (i32, i32) {
    %c0_i32 = arith.constant 0 : i32
    %c0_i32_0 = arith.constant 0 : i32
    %c0_i32_1 = arith.constant 0 : i32
    return %c0_i32, %c0_i32_0 : i32, i32
  }
  func.func @transform_7(%arg0: i32) -> (i32, i32) {
    %c0_i32 = arith.constant 0 : i32
    %c0_i32_0 = arith.constant 0 : i32
    %c0_i32_1 = arith.constant 0 : i32
    return %c0_i32, %c0_i32_0 : i32, i32
  }
  func.func @transform_8(%arg0: i32) -> (i32, i32) {
    %c0_i32 = arith.constant 0 : i32
    %c0_i32_0 = arith.constant 0 : i32
    %c0_i32_1 = arith.constant 0 : i32
    return %c0_i32, %c0_i32_0 : i32, i32
  }
  func.func @transform_9(%arg0: i32) -> (i32, i32) {
    %c0_i32 = arith.constant 0 : i32
    %c0_i32_0 = arith.constant 0 : i32
    %c0_i32_1 = arith.constant 0 : i32
    return %c0_i32, %c0_i32_0 : i32, i32
  }
  func.func @transform_10(%arg0: i32) -> (i32, i32) {
    %c0_i32 = arith.constant 0 : i32
    %c0_i32_0 = arith.constant 0 : i32
    %c0_i32_1 = arith.constant 0 : i32
    return %c0_i32, %c0_i32_0 : i32, i32
  }
  func.func @transform_11(%arg0: i32) -> (i32, i32) {
    %c0_i32 = arith.constant 0 : i32
    %c0_i32_0 = arith.constant 0 : i32
    %c0_i32_1 = arith.constant 0 : i32
    return %c0_i32, %c0_i32_0 : i32, i32
  }
  func.func @transform_12(%arg0: i32) -> (i32, i32) {
    %c0_i32 = arith.constant 0 : i32
    %c0_i32_0 = arith.constant 0 : i32
    %c0_i32_1 = arith.constant 0 : i32
    return %c0_i32, %c0_i32_0 : i32, i32
  }
  func.func @transform_13(%arg0: i32) -> (i32, i32, i32) {
    %c0_i32 = arith.constant 0 : i32
    %c0_i32_0 = arith.constant 0 : i32
    %c0_i32_1 = arith.constant 0 : i32
    return %arg0, %c0_i32, %c0_i32_0 : i32, i32, i32
  }
}

</mosaic_0001>

<bundles_post_ra>
// kernel: tpu_custom_call.1
= control target key start
LH: loop header
LB: loop body
LE: loop exit
PB: predicated region body
PF: predicated region fallthrough
CT: control target
= control target key end

     0   :  { %vm147_vm0 = vcmask 261120   ;;  %s8869_s0 = inlined_call_operand.vmem [shape: f32[16,8,32], index: 0, kind: input, shape index: {}]   ;;  %s8870_s1 = inlined_call_operand.vmem [shape: s32[16,8,8], index: 1, kind: input, shape index: {}]   ;;  %s8871_s2 = inlined_call_operand.vmem [shape: s32[16,8,8], index: 2, kind: input, shape index: {}]   ;;  %s8872_s3 = inlined_call_operand.vmem [shape: f32[32,128], index: 3, kind: input, shape index: {}]   ;;  %s8873_s4 = inlined_call_operand.vmem [shape: f32[1,128], index: 4, kind: input, shape index: {}]   ;;  %s8874_s5 = inlined_call_operand.vmem [shape: f32[128,32], index: 5, kind: input, shape index: {}]   ;;  %s8875_s6 = inlined_call_operand.vmem [shape: f32[1,32], index: 6, kind: input, shape index: {}]   ;;  %s8876_s7 = inlined_call_operand.vmem [shape: f32[1,32], index: 7, kind: input, shape index: {}]   ;;  %s8877_s8 = inlined_call_operand.vmem [shape: f32[1,32], index: 8, kind: input, shape index: {}]   ;;  %s8878_s9 = inlined_call_operand.vmem [shape: f32[32,32], index: 9, kind: input, shape index: {}]   ;;  %s8879_s10 = inlined_call_operand.vmem [shape: f32[1,32], index: 10, kind: input, shape index: {}]   ;;  %s8880_s11 = inlined_call_operand.vmem [shape: f32[32,32], index: 11, kind: input, shape index: {}]   ;;  %s8881_s12 = inlined_call_operand.vmem [shape: f32[1,32], index: 12, kind: input, shape index: {}]   ;;  %s8882_s13 = inlined_call_operand.hbm [shape: f32[16,8,32], index: 13, kind: output, shape index: {}]  }
   0x1   :  { %v125_v0 = vld [vmem:[%s8872_s3] sm:$0xff]  ;;  %v126_v1 = vld [vmem:[%s8872_s3 + $0x8] sm:$0xff]  ;;  %v127_v2 = vld [vmem:[%s8872_s3 + $0x10] sm:$0xff] }
   0x2   :  { %v7079_v3 = vpack.c.bf16 %v126_v1, %v125_v0  ;;  %v128_v4 = vld [vmem:[%s8872_s3 + $0x18] sm:$0xff]  ;;  %v45_v5 = vld [vmem:[%s8869_s0] sm:$0xff] }
   0x3   :  { %v7083_v6 = vpack.c.bf16 %v128_v4, %v127_v2  ;;  %6615 = vmatprep.mubr.msk.f32.mxu0 %vm147_vm0, %v45_v5 }
   0x4   :  { %7080 = vmatprep.subr.bf16.mxu0 %v7079_v3 }
   0x5   :  { %7082 = vmatpush3.bf16.msra.mxu0 %v7079_v3 }
   0x6   :  { %7084 = vmatprep.subr.bf16.mxu0 %v7083_v6 }
   0x7   :  { %18 = vsyncpa [#allocation3], 0  ;;  %v46_v7 = vld [vmem:[%s8869_s0 + $0x8] sm:$0xff]  ;;  %v47_v8 = vld [vmem:[%s8869_s0 + $0x10] sm:$0xff]  ;;  %v7247_v22 = vmov 0.0   ;;  %vm7248_vm1 = vmmov 0  }
   0x8   :  { %v48_v9 = vld [vmem:[%s8869_s0 + $0x18] sm:$0xff]  ;;  %v49_v10 = vld [vmem:[%s8869_s0 + $0x20] sm:$0xff]  ;;  %v50_v11 = vld [vmem:[%s8869_s0 + $0x28] sm:$0xff]  ;;  %6639 = vmatprep.subr.mxu1 %v7247_v22  ;;  %6641 = vmatprep.mubr.msk.f32.mxu1 %vm7248_vm1, %v7247_v22  ;;  %vm341_vm2 = vcmask 64512   ;;  %s7249_s16 = smov 64   ;;  %vm2806_vm3 = vcmask 523264  }
   0x9   :  { %7086 = vmatpush3.bf16.msra.mxu0 %v7083_v6  ;;  %v51_v12 = vld [vmem:[%s8869_s0 + $0x30] sm:$0xff]  ;;  %v52_v13 = vld [vmem:[%s8869_s0 + $0x38] sm:$0xff]  ;;  %v53_v14 = vld [vmem:[%s8869_s0 + $0x40] sm:$0xff]  ;;  %vm5374_vm4 = vcmask 130048  }
   0xa   :  { %v54_v15 = vld [vmem:[%s8869_s0 + $0x48] sm:$0xff]  ;;  %v55_v16 = vld [vmem:[%s8869_s0 + $0x50] sm:$0xff]  ;;  %v56_v17 = vld [vmem:[%s8869_s0 + $0x58] sm:$0xff]  ;;  %6689 = vmatprep.subr.mxu0 %v7247_v22 }
   0xb   :  { %v57_v18 = vld [vmem:[%s8869_s0 + $0x60] sm:$0xff]  ;;  %v58_v19 = vld [vmem:[%s8869_s0 + $0x68] sm:$0xff]  ;;  %v59_v20 = vld [vmem:[%s8869_s0 + $0x70] sm:$0xff] }
   0xc   :  { %6616 = vmatmul.mubr.msk.f32.vlgmr.msra.gmra.mrb[0].mxu0 %vm147_vm0, %v46_v7  ;;  %v60_v21 = vld [vmem:[%s8869_s0 + $0x78] sm:$0xff]  ;;  %v7410_v23 = vld [vmem:[%s8870_s1] sm:$0xff]  ;;  %v7416_v26 = vld [vmem:[%s8870_s1 + $0x8] sm:$0xff] }
   0xd   :  { %6618 = vmatprep.mubr.msk.f32.mxu0 %vm147_vm0, %v47_v8  ;;  %v77_v24 = vcvt.s32.f32 %v7410_v23  ;;  %v8913_v28 = vcvt.s32.f32 %v7416_v26  ;;  %v7429_v30 = vld [vmem:[%s8870_s1 + $0x10] sm:$0xff]  ;;  %v7443_v34 = vld [vmem:[%s8870_s1 + $0x18] sm:$0xff]  ;;  %v7457_v38 = vld [vmem:[%s8870_s1 + $0x20] sm:$0xff] }
   0xe   :  { %v8912_v32 = vcvt.s32.f32 %v7429_v30  ;;  %v8911_v36 = vcvt.s32.f32 %v7443_v34  ;;  %v8910_v40 = vcvt.s32.f32 %v7457_v38  ;;  %v7471_v42 = vld [vmem:[%s8870_s1 + $0x28] sm:$0xff]  ;;  %v7485_v46 = vld [vmem:[%s8870_s1 + $0x30] sm:$0xff]  ;;  %v7505_v52 = vld [vmem:[%s8870_s1 + $0x38] sm:$0xff] }
   0xf   :  { %v8909_v44 = vcvt.s32.f32 %v7471_v42  ;;  %v7490_v47 = vld [vmem:[%s8870_s1 + $0x50] sm:$0xff]  ;;  %v8908_v49 = vcvt.s32.f32 %v7485_v46  ;;  %v8907_v54 = vcvt.s32.f32 %v7505_v52  ;;  %v7521_v55 = vld [vmem:[%s8870_s1 + $0x60] sm:$0xff]  ;;  %v7550_v62 = vld [vmem:[%s8870_s1 + $0x48] sm:$0xff] }
  0x10   :  { %6619 = vmatmul.mubr.msk.f32.gmra.mrb[2].mxu0 %vm147_vm0, %v48_v9  ;;  %v8903_v50 = vcvt.s32.f32 %v7490_v47  ;;  %v7528_v57 = vld [vmem:[%s8870_s1 + $0x40] sm:$0xff]  ;;  %v8901_v59 = vcvt.s32.f32 %v7521_v55  ;;  %v7543_v61 = vld [vmem:[%s8870_s1 + $0x70] sm:$0xff]  ;;  %v8904_v0 = vcvt.s32.f32 %v7550_v62  ;;  %v7568_v1 = vld [vmem:[%s8870_s1 + $0x58] sm:$0xff] }
  0x11   :  { %6621 = vmatprep.mubr.msk.f32.mxu0 %vm147_vm0, %v49_v10  ;;  %v8905_v60 = vcvt.s32.f32 %v7528_v57  ;;  %v8899_v63 = vcvt.s32.f32 %v7543_v61  ;;  %v8902_v2 = vcvt.s32.f32 %v7568_v1  ;;  %v7588_v3 = vld [vmem:[%s8870_s1 + $0x68] sm:$0xff]  ;;  %v7600_v5 = vld [vmem:[%s8870_s1 + $0x78] sm:$0xff]  ;;  %v7618_v7 = vld [vmem:[%s8871_s2] sm:$0xff] }
  0x12   :  { %v8900_v4 = vcvt.s32.f32 %v7588_v3  ;;  %v8906_v6 = vcvt.s32.f32 %v7600_v5  ;;  %v8897_v8 = vcvt.s32.f32 %v7618_v7  ;;  %v7624_v9 = vld [vmem:[%s8871_s2 + $0x8] sm:$0xff]  ;;  %v7629_v10 = vld [vmem:[%s8871_s2 + $0x10] sm:$0xff] }
  0x14   :  { %6622 = vmatmul.mubr.msk.f32.gmra.mrb[4].mxu0 %vm147_vm0, %v50_v11 }
  0x15   :  { %6624 = vmatprep.mubr.msk.f32.mxu0 %vm147_vm0, %v51_v12  ;;  %v8898_v12 = vcvt.s32.f32 %v7624_v9 }
  0x18   :  { %6625 = vmatmul.mubr.msk.f32.gmra.mrb[6].mxu0 %vm147_vm0, %v52_v13  ;;  %v8895_v13 = vcvt.s32.f32 %v7629_v10 }
  0x19   :  { %6627 = vmatprep.mubr.msk.f32.mxu0 %vm147_vm0, %v53_v14  ;;  %v7642_v14 = vld [vmem:[%s8871_s2 + $0x18] sm:$0xff] }
  0x1c   :  { %6628 = vmatmul.mubr.msk.f32.gmra.mrb[8].mxu0 %vm147_vm0, %v54_v15  ;;  %v7647_v15 = vld [vmem:[%s8871_s2 + $0x20] sm:$0xff] }
  0x1d   :  { %6630 = vmatprep.mubr.msk.f32.mxu0 %vm147_vm0, %v55_v16 }
  0x20   :  { %6631 = vmatmul.mubr.msk.f32.gmra.mrb[10].mxu0 %vm147_vm0, %v56_v17 }
  0x21   :  { %6633 = vmatprep.mubr.msk.f32.mxu0 %vm147_vm0, %v57_v18  ;;  %v8896_v18 = vcvt.s32.f32 %v7642_v14 }
  0x24   :  { %6634 = vmatmul.mubr.msk.f32.gmra.mrb[12].mxu0 %vm147_vm0, %v58_v19  ;;  %v8892_v19 = vcvt.s32.f32 %v7647_v15 }
  0x25   :  { %6636 = vmatprep.mubr.msk.f32.mxu0 %vm147_vm0, %v59_v20  ;;  %v7662_v20 = vld [vmem:[%s8871_s2 + $0x28] sm:$0xff] }
  0x28   :  { %6637 = vmatmul.mubr.msk.f32.gmra.mrb[14].mxu0 %vm147_vm0, %v60_v21  ;;  %v7667_v21 = vld [vmem:[%s8871_s2 + $0x30] sm:$0xff] }
  0x29   :  { %6691 = vmatprep.mubr.msk.f32.mxu0 %vm7248_vm1, %v7247_v22 }
  0xdf   :  { %v6617_v25 = vpop.f32.mrb[0].mxu0 }
  0xe0   :  { %v262_v27 = vpop.f32.mrb[1].mxu0 }
  0xe1   :  { %1511 = vrot.lane.b32.xlu0 %v262_v27, %s7249_s16  ;;  %6640 = vmatpush3.msra.mxu1 %v262_v27 }
  0xe2   :  { %6642 = vmatmul.mubr.msk.f32.vlgmr.msra.gmra.mrb[0].mxu1 %vm341_vm2, %v77_v24  ;;  %6644 = vmatprep.subr.mxu1 %v7247_v22 }
  0xe3   :  { %v6620_v29 = vpop.f32.mrb[2].mxu0  ;;  %6645 = vmatpush3.msra.mxu1 %v6617_v25  ;;  %6646 = vmatprep.mubr.msk.f32.mxu1 %vm7248_vm1, %v7247_v22 }
  0xe4   :  { %v272_v31 = vpop.f32.mrb[3].mxu0  ;;  %6649 = vmatprep.subr.mxu1 %v7247_v22 }
  0xe5   :  { %1588 = vrot.lane.b32.xlu0 %v6617_v25, %s7249_s16  ;;  %1665 = vrot.lane.b32.xlu1 %v272_v31, %s7249_s16 }
  0xe6   :  { %6647 = vmatmul.mubr.msk.f32.vlgmr.msra.gmra.mrb[2].mxu1 %vm341_vm2, %v8913_v28 }
  0xe7   :  { %6650 = vmatpush3.msra.mxu1 %v272_v31  ;;  %v6623_v33 = vpop.f32.mrb[4].mxu0  ;;  %6651 = vmatprep.mubr.msk.f32.mxu1 %vm7248_vm1, %v7247_v22  ;;  %v8890_v31 = vcvt.s32.f32 %v7667_v21 }
  0xe8   :  { %v282_v35 = vpop.f32.mrb[5].mxu0  ;;  %6654 = vmatprep.subr.mxu1 %v7247_v22 }
  0xe9   :  { %1742 = vrot.lane.b32.xlu1 %v6620_v29, %s7249_s16  ;;  %1819 = vrot.lane.b32.xlu0 %v282_v35, %s7249_s16 }
  0xea   :  { %6652 = vmatmul.mubr.msk.f32.vlgmr.msra.gmra.mrb[4].mxu1 %vm341_vm2, %v8912_v32 }
  0xeb   :  { %6655 = vmatpush3.msra.mxu1 %v6620_v29  ;;  %v6626_v37 = vpop.f32.mrb[6].mxu0  ;;  %6656 = vmatprep.mubr.msk.f32.mxu1 %vm7248_vm1, %v7247_v22  ;;  %v8894_v29 = vcvt.s32.f32 %v7662_v20 }
  0xec   :  { %v292_v39 = vpop.f32.mrb[7].mxu0  ;;  %6659 = vmatprep.subr.mxu1 %v7247_v22 }
  0xed   :  { %1896 = vrot.lane.b32.xlu1 %v6623_v33, %s7249_s16  ;;  %1973 = vrot.lane.b32.xlu0 %v292_v39, %s7249_s16 }
  0xee   :  { %6657 = vmatmul.mubr.msk.f32.vlgmr.msra.gmra.mrb[6].mxu1 %vm341_vm2, %v8911_v36 }
  0xef   :  { %6660 = vmatpush3.msra.mxu1 %v282_v35  ;;  %v6629_v41 = vpop.f32.mrb[8].mxu0  ;;  %6661 = vmatprep.mubr.msk.f32.mxu1 %vm7248_vm1, %v7247_v22  ;;  %v7691_v35 = vld [vmem:[%s8871_s2 + $0x40] sm:$0xff] }
  0xf0   :  { %v302_v43 = vpop.f32.mrb[9].mxu0  ;;  %6664 = vmatprep.subr.mxu1 %v7247_v22 }
  0xf1   :  { %2050 = vrot.lane.b32.xlu1 %v6626_v37, %s7249_s16  ;;  %2127 = vrot.lane.b32.xlu0 %v302_v43, %s7249_s16 }
  0xf2   :  { %6662 = vmatmul.mubr.msk.f32.vlgmr.msra.gmra.mrb[8].mxu1 %vm341_vm2, %v8910_v40 }
  0xf3   :  { %6665 = vmatpush3.msra.mxu1 %v6623_v33  ;;  %v6632_v45 = vpop.f32.mrb[10].mxu0  ;;  %6666 = vmatprep.mubr.msk.f32.mxu1 %vm7248_vm1, %v7247_v22  ;;  %v7686_v33 = vld [vmem:[%s8871_s2 + $0x38] sm:$0xff] }
  0xf4   :  { %v312_v48 = vpop.f32.mrb[11].mxu0  ;;  %6669 = vmatprep.subr.mxu1 %v7247_v22 }
  0xf5   :  { %2204 = vrot.lane.b32.xlu1 %v6629_v41, %s7249_s16  ;;  %2281 = vrot.lane.b32.xlu0 %v312_v48, %s7249_s16 }
  0xf6   :  { %6667 = vmatmul.mubr.msk.f32.vlgmr.msra.gmra.mrb[10].mxu1 %vm341_vm2, %v8909_v44  ;;  %6690 = vmatpush3.msra.mxu0 %v312_v48  ;;  %v7715_v48 = vld [vmem:[%s8871_s2 + $0x50] sm:$0xff] }
  0xf7   :  { %6670 = vmatpush3.msra.mxu1 %v292_v39  ;;  %v6635_v51 = vpop.f32.mrb[12].mxu0  ;;  %6671 = vmatprep.mubr.msk.f32.mxu1 %vm7248_vm1, %v7247_v22 }
  0xf8   :  { %v322_v53 = vpop.f32.mrb[13].mxu0  ;;  %6674 = vmatprep.subr.mxu1 %v7247_v22  ;;  %6699 = vmatprep.subr.mxu0 %v7247_v22 }
  0xf9   :  { %2358 = vrot.lane.b32.xlu1 %v6632_v45, %s7249_s16  ;;  %2435 = vrot.lane.b32.xlu0 %v322_v53, %s7249_s16 }
  0xfa   :  { %6672 = vmatmul.mubr.msk.f32.vlgmr.msra.gmra.mrb[12].mxu1 %vm341_vm2, %v8908_v49  ;;  %6692 = vmatmul.mubr.msk.f32.vlgmr.msra.gmra.mrb[16].mxu0 %vm341_vm2, %v8903_v50 }
  0xfb   :  { %6675 = vmatpush3.msra.mxu1 %v6626_v37  ;;  %v6638_v56 = vpop.f32.mrb[14].mxu0  ;;  %6676 = vmatprep.mubr.msk.f32.mxu1 %vm7248_vm1, %v7247_v22 }
  0xfc   :  { %v332_v58 = vpop.f32.mrb[15].mxu0  ;;  %6679 = vmatprep.subr.mxu1 %v7247_v22  ;;  %6700 = vmatpush3.msra.mxu0 %v322_v53 }
  0xfd   :  { %2512 = vrot.lane.b32.xlu1 %v6635_v51, %s7249_s16  ;;  %2589 = vrot.lane.b32.xlu0 %v332_v58, %s7249_s16 }
  0xfe   :  { %6677 = vmatmul.mubr.msk.f32.vlgmr.msra.gmra.mrb[14].mxu1 %vm341_vm2, %v8907_v54  ;;  %6701 = vmatprep.mubr.msk.f32.mxu0 %vm7248_vm1, %v7247_v22 }
  0xff   :  { %6680 = vmatpush3.msra.mxu1 %v302_v43  ;;  %6681 = vmatprep.mubr.msk.f32.mxu1 %vm7248_vm1, %v7247_v22  ;;  %v8884_v43 = vcvt.s32.f32 %v7691_v35 }
 0x100   :  { %6684 = vmatprep.subr.mxu1 %v7247_v22  ;;  %6709 = vmatprep.subr.mxu0 %v7247_v22 }
 0x101   :  { %2666 = vrot.lane.b32.xlu1 %v6638_v56, %s7249_s16  ;;  %6702 = vmatmul.mubr.msk.f32.vlgmr.msra.gmra.mrb[18].mxu0 %vm341_vm2, %v8901_v59 }
 0x102   :  { %6682 = vmatmul.mubr.msk.f32.vlgmr.msra.gmra.mrb[16].mxu1 %vm341_vm2, %v8905_v60  ;;  %6710 = vmatpush3.msra.mxu0 %v332_v58  ;;  %v8883_v58 = vcvt.s32.f32 %v7715_v48 }
 0x103   :  { %6685 = vmatpush3.msra.mxu1 %v6629_v41  ;;  %6686 = vmatprep.mubr.msk.f32.mxu1 %vm7248_vm1, %v7247_v22  ;;  %v8891_v41 = vcvt.s32.f32 %v7686_v33 }
 0x104   :  { %6694 = vmatprep.subr.mxu1 %v7247_v22  ;;  %6711 = vmatprep.mubr.msk.f32.mxu0 %vm7248_vm1, %v7247_v22 }
 0x105   :  { %6712 = vmatmul.mubr.msk.f32.vlgmr.msra.gmra.mrb[20].mxu0 %vm341_vm2, %v8899_v63  ;;  %6719 = vmatprep.subr.mxu0 %v7247_v22 }
 0x106   :  { %6687 = vmatmul.mubr.msk.f32.vlgmr.msra.gmra.mrb[18].mxu1 %vm341_vm2, %v8904_v0  ;;  %6721 = vmatprep.mubr.msk.f32.mxu0 %vm7248_vm1, %v7247_v22 }
 0x107   :  { %6695 = vmatpush3.msra.mxu1 %v6632_v45  ;;  %6696 = vmatprep.mubr.msk.f32.mxu1 %vm7248_vm1, %v7247_v22  ;;  %v7710_v45 = vld [vmem:[%s8871_s2 + $0x48] sm:$0xff] }
 0x108   :  { %6704 = vmatprep.subr.mxu1 %v7247_v22 }
 0x10a   :  { %6697 = vmatmul.mubr.msk.f32.vlgmr.msra.gmra.mrb[20].mxu1 %vm341_vm2, %v8902_v2 }
 0x10b   :  { %6705 = vmatpush3.msra.mxu1 %v6635_v51  ;;  %6706 = vmatprep.mubr.msk.f32.mxu1 %vm7248_vm1, %v7247_v22 }
 0x10c   :  { %6714 = vmatprep.subr.mxu1 %v7247_v22 }
 0x10e   :  { %6707 = vmatmul.mubr.msk.f32.vlgmr.msra.gmra.mrb[22].mxu1 %vm341_vm2, %v8900_v4 }
 0x10f   :  { %6715 = vmatpush3.msra.mxu1 %v6638_v56  ;;  %6716 = vmatprep.mubr.msk.f32.mxu1 %vm7248_vm1, %v7247_v22  ;;  %v8889_v56 = vcvt.s32.f32 %v7710_v45 }
 0x110   :  { %6724 = vmatprep.subr.mxu1 %v7247_v22 }
 0x112   :  { %6717 = vmatmul.mubr.msk.f32.vlgmr.msra.gmra.mrb[24].mxu1 %vm341_vm2, %v8906_v6 }
 0x113   :  { %6726 = vmatprep.mubr.msk.f32.mxu1 %vm7248_vm1, %v7247_v22 }
 0x153   :  { %v1512_v11 = vpop.permute.xlu0 %1511 }
 0x154   :  { %6720 = vmatpush3.msra.mxu0 %v1512_v11  ;;  %v7734_v11 = vld [vmem:[%s8871_s2 + $0x58] sm:$0xff] }
 0x155   :  { %6722 = vmatmul.mubr.msk.f32.vlgmr.msra.gmra.mrb[22].mxu0 %vm341_vm2, %v8897_v8  ;;  %6729 = vmatprep.subr.mxu0 %v7247_v22  ;;  %v134_v8 = vld [vmem:[%s8874_s5 + $0x20] sm:$0xff] }
 0x156   :  { %6731 = vmatprep.mubr.msk.f32.mxu0 %vm7248_vm1, %v7247_v22 }
 0x157   :  { %v1589_v16 = vpop.permute.xlu0 %1588  ;;  %v1666_v17 = vpop.permute.xlu1 %1665 }
 0x158   :  { %6725 = vmatpush3.msra.mxu1 %v1589_v16  ;;  %6730 = vmatpush3.msra.mxu0 %v1666_v17  ;;  %v7739_v16 = vld [vmem:[%s8871_s2 + $0x60] sm:$0xff] }
 0x159   :  { %6727 = vmatmul.mubr.msk.f32.vlgmr.msra.gmra.mrb[26].mxu1 %vm341_vm2, %v8898_v12  ;;  %6732 = vmatmul.mubr.msk.f32.vlgmr.msra.gmra.mrb[24].mxu0 %vm341_vm2, %v8895_v13  ;;  %v130_v13 = vld [vmem:[%s8874_s5] sm:$0xff]  ;;  %v135_v12 = vld [vmem:[%s8874_s5 + $0x28] sm:$0xff] }
 0x15a   :  { %6734 = vmatprep.subr.mxu1 %v7247_v22  ;;  %6739 = vmatprep.subr.mxu0 %v7247_v22 }
 0x15b   :  { %v1743_v25 = vpop.permute.xlu1 %1742  ;;  %v1820_v27 = vpop.permute.xlu0 %1819  ;;  %6736 = vmatprep.mubr.msk.f32.mxu1 %vm7248_vm1, %v7247_v22  ;;  %6741 = vmatprep.mubr.msk.f32.mxu0 %vm7248_vm1, %v7247_v22 }
 0x15c   :  { %6735 = vmatpush3.msra.mxu1 %v1743_v25  ;;  %6740 = vmatpush3.msra.mxu0 %v1820_v27  ;;  %v8886_v27 = vcvt.s32.f32 %v7734_v11 }
 0x15d   :  { %6737 = vmatmul.mubr.msk.f32.vlgmr.msra.gmra.mrb[28].mxu1 %vm341_vm2, %v8896_v18  ;;  %6742 = vmatmul.mubr.msk.f32.vlgmr.msra.gmra.mrb[26].mxu0 %vm341_vm2, %v8892_v19 }
 0x15e   :  { %6744 = vmatprep.subr.mxu1 %v7247_v22  ;;  %6749 = vmatprep.subr.mxu0 %v7247_v22 }
 0x15f   :  { %v1897_v37 = vpop.permute.xlu1 %1896  ;;  %v1974_v39 = vpop.permute.xlu0 %1973  ;;  %6746 = vmatprep.mubr.msk.f32.mxu1 %vm7248_vm1, %v7247_v22  ;;  %6751 = vmatprep.mubr.msk.f32.mxu0 %vm7248_vm1, %v7247_v22 }
 0x160   :  { %6745 = vmatpush3.msra.mxu1 %v1897_v37  ;;  %6750 = vmatpush3.msra.mxu0 %v1974_v39  ;;  %v8885_v37 = vcvt.s32.f32 %v7739_v16  ;;  %v7758_v39 = vld [vmem:[%s8871_s2 + $0x68] sm:$0xff] }
 0x161   :  { %6747 = vmatmul.mubr.msk.f32.vlgmr.msra.gmra.mrb[30].mxu1 %vm341_vm2, %v8894_v29  ;;  %6752 = vmatmul.mubr.msk.f32.vlgmr.msra.gmra.mrb[28].mxu0 %vm341_vm2, %v8890_v31 }
 0x162   :  { %6754 = vmatprep.subr.mxu1 %v7247_v22  ;;  %6759 = vmatprep.subr.mxu0 %v7247_v22 }
 0x163   :  { %v2051_v51 = vpop.permute.xlu1 %2050  ;;  %v2128_v53 = vpop.permute.xlu0 %2127  ;;  %6756 = vmatprep.mubr.msk.f32.mxu1 %vm7248_vm1, %v7247_v22  ;;  %6761 = vmatprep.mubr.msk.f32.mxu0 %vm7248_vm1, %v7247_v22 }
 0x164   :  { %6755 = vmatpush3.msra.mxu1 %v2051_v51  ;;  %6760 = vmatpush3.msra.mxu0 %v2128_v53  ;;  %v7763_v51 = vld [vmem:[%s8871_s2 + $0x70] sm:$0xff] }
 0x165   :  { %6757 = vmatmul.mubr.msk.f32.vlgmr.msra.gmra.mrb[32].mxu1 %vm341_vm2, %v8891_v41  ;;  %6762 = vmatmul.mubr.msk.f32.vlgmr.msra.gmra.mrb[30].mxu0 %vm341_vm2, %v8884_v43 }
 0x166   :  { %6764 = vmatprep.subr.mxu1 %v7247_v22  ;;  %6769 = vmatprep.subr.mxu0 %v7247_v22 }
 0x167   :  { %v2205_v17 = vpop.permute.xlu1 %2204  ;;  %v2282_v25 = vpop.permute.xlu0 %2281  ;;  %6766 = vmatprep.mubr.msk.f32.mxu1 %vm7248_vm1, %v7247_v22  ;;  %6771 = vmatprep.mubr.msk.f32.mxu0 %vm7248_vm1, %v7247_v22 }
 0x168   :  { %6765 = vmatpush3.msra.mxu1 %v2205_v17  ;;  %6770 = vmatpush3.msra.mxu0 %v2282_v25  ;;  %v8888_v25 = vcvt.s32.f32 %v7758_v39 }
 0x169   :  { %6767 = vmatmul.mubr.msk.f32.vlgmr.msra.gmra.mrb[34].mxu1 %vm341_vm2, %v8889_v56  ;;  %6772 = vmatmul.mubr.msk.f32.vlgmr.msra.gmra.mrb[32].mxu0 %vm341_vm2, %v8883_v58  ;;  %v8887_v58 = vcvt.s32.f32 %v7763_v51 }
 0x16a   :  { %6774 = vmatprep.subr.mxu1 %v7247_v22  ;;  %6779 = vmatprep.subr.mxu0 %v7247_v22 }
 0x16b   :  { %v2359_v53 = vpop.permute.xlu1 %2358  ;;  %v2436_v17 = vpop.permute.xlu0 %2435  ;;  %6776 = vmatprep.mubr.msk.f32.mxu1 %vm7248_vm1, %v7247_v22  ;;  %6781 = vmatprep.mubr.msk.f32.mxu0 %vm7248_vm1, %v7247_v22 }
 0x16c   :  { %6775 = vmatpush3.msra.mxu1 %v2359_v53  ;;  %6780 = vmatpush3.msra.mxu0 %v2436_v17  ;;  %v7782_v53 = vld [vmem:[%s8871_s2 + $0x78] sm:$0xff] }
 0x16d   :  { %6777 = vmatmul.mubr.msk.f32.vlgmr.msra.gmra.mrb[36].mxu1 %vm341_vm2, %v8886_v27  ;;  %6782 = vmatmul.mubr.msk.f32.vlgmr.msra.gmra.mrb[34].mxu0 %vm341_vm2, %v8885_v37  ;;  %v8893_v37 = vcvt.s32.f32 %v7782_v53 }
 0x16e   :  { %6784 = vmatprep.subr.mxu1 %v7247_v22  ;;  %6789 = vmatprep.subr.mxu0 %v7247_v22 }
 0x16f   :  { %v2513_v17 = vpop.permute.xlu1 %2512  ;;  %v2590_v43 = vpop.permute.xlu0 %2589  ;;  %6786 = vmatprep.mubr.msk.f32.mxu1 %vm7248_vm1, %v7247_v22  ;;  %6791 = vmatprep.mubr.msk.f32.mxu0 %vm7248_vm1, %v7247_v22 }
 0x170   :  { %6785 = vmatpush3.msra.mxu1 %v2513_v17  ;;  %6790 = vmatpush3.msra.mxu0 %v2590_v43 }
 0x171   :  { %6787 = vmatmul.mubr.msk.f32.vlgmr.msra.gmra.mrb[38].mxu1 %vm341_vm2, %v8888_v25  ;;  %6792 = vmatmul.mubr.msk.f32.vlgmr.msra.gmra.mrb[36].mxu0 %vm341_vm2, %v8887_v58 }
 0x172   :  { %6794 = vmatprep.subr.mxu1 %v7247_v22  ;;  %6796 = vmatprep.mubr.msk.f32.mxu1 %vm7248_vm1, %v7247_v22 }
 0x173   :  { %v2667_v27 = vpop.permute.xlu1 %2666 }
 0x174   :  { %6795 = vmatpush3.msra.mxu1 %v2667_v27 }
 0x175   :  { %6797 = vmatmul.mubr.msk.f32.vlgmr.msra.gmra.mrb[40].mxu1 %vm341_vm2, %v8893_v37  ;;  %6855 = vmatprep.subr.mxu1 %v7247_v22 }
 0x176   :  { %6857 = vmatprep.mubr.msk.f32.mxu1 %vm7248_vm1, %v7247_v22 }
 0x1b5   :  { %v7804_v43 = vpop.f32.mrb[0].mxu1 }
 0x1b6   :  { %v6643_v17 = vpop.f32.mrb[1].mxu1 }
 0x1b7   :  { %v131_v17 = vld [vmem:[%s8874_s5 + $0x8] sm:$0xff] }
 0x1b8   :  { %v7087_v18 = vpack.c.bf16 %v131_v17, %v130_v13 }
 0x1b9   :  { %v7806_v58 = vpop.f32.mrb[2].mxu1 }
 0x1ba   :  { %v6648_v25 = vpop.f32.mrb[3].mxu1  ;;  %7088 = vmatprep.subr.bf16.mxu0 %v7087_v18 }
 0x1bb   :  { %7090 = vmatpush3.bf16.msra.mxu0 %v7087_v18  ;;  %v138_v18 = vld [vmem:[%s8874_s5 + $0x40] sm:$0xff] }
 0x1bd   :  { %v7808_v56 = vpop.f32.mrb[4].mxu1 }
 0x1be   :  { %v6653_v31 = vpop.f32.mrb[5].mxu1 }
 0x1bf   :  { %v132_v31 = vld [vmem:[%s8874_s5 + $0x10] sm:$0xff] }
 0x1c1   :  { %v7810_v41 = vpop.f32.mrb[6].mxu1 }
 0x1c2   :  { %v6658_v27 = vpop.f32.mrb[7].mxu1 }
 0x1c5   :  { %v7812_v19 = vpop.f32.mrb[8].mxu1 }
 0x1c6   :  { %v6663_v37 = vpop.f32.mrb[9].mxu1 }
 0x1c7   :  { %v133_v37 = vld [vmem:[%s8874_s5 + $0x18] sm:$0xff] }
 0x1c8   :  { %v7091_v27 = vpack.c.bf16 %v133_v37, %v132_v31  ;;  %v136_v31 = vld [vmem:[%s8874_s5 + $0x30] sm:$0xff]  ;;  %v137_v37 = vld [vmem:[%s8874_s5 + $0x38] sm:$0xff] }
 0x1c9   :  { %v7814_v29 = vpop.f32.mrb[10].mxu1  ;;  %v7099_v50 = vpack.c.bf16 %v137_v37, %v136_v31  ;;  %v141_v31 = vld [vmem:[%s8874_s5 + $0x58] sm:$0xff] }
 0x1ca   :  { %v6668_v25 = vpop.f32.mrb[11].mxu1  ;;  %7092 = vmatprep.subr.bf16.mxu0 %v7091_v27 }
 0x1cb   :  { %v7095_v25 = vpack.c.bf16 %v135_v12, %v134_v8  ;;  %7094 = vmatpush3.bf16.msra.mxu0 %v7091_v27  ;;  %v139_v8 = vld [vmem:[%s8874_s5 + $0x48] sm:$0xff] }
 0x1cc   :  { %v7103_v27 = vpack.c.bf16 %v139_v8, %v138_v18 }
 0x1cd   :  { %v7834_v63 = vpop.f32.mrb[12].mxu1  ;;  %v7836_v4 = vpop.f32.mrb[16].mxu0  ;;  %7096 = vmatprep.subr.bf16.mxu0 %v7095_v25 }
 0x1ce   :  { %v6673_v13 = vpop.f32.mrb[13].mxu1  ;;  %v6693_v17 = vpop.f32.mrb[17].mxu0 }
 0x1cf   :  { %7098 = vmatpush3.bf16.msra.mxu0 %v7095_v25 }
 0x1d0   :  { %7100 = vmatprep.subr.bf16.mxu0 %v7099_v50 }
 0x1d1   :  { %v7844_v59 = vpop.f32.mrb[14].mxu1 }
 0x1d2   :  { %v6678_v2 = vpop.f32.mrb[15].mxu1 }
 0x1d3   :  { %v140_v2 = vld [vmem:[%s8874_s5 + $0x50] sm:$0xff]  ;;  %7102 = vmatpush3.bf16.msra.mxu0 %v7099_v50  ;;  %v143_v50 = vld [vmem:[%s8874_s5 + $0x68] sm:$0xff] }
 0x1d4   :  { %v7852_v12 = vpop.f32.mrb[18].mxu0  ;;  %7104 = vmatprep.subr.bf16.mxu0 %v7103_v27  ;;  %v7107_v25 = vpack.c.bf16 %v141_v31, %v140_v2  ;;  %v145_v2 = vld [vmem:[%s8874_s5 + $0x78] sm:$0xff] }
 0x1d5   :  { %v7854_v13 = vpop.f32.mrb[16].mxu1  ;;  %v6703_v17 = vpop.f32.mrb[19].mxu0 }
 0x1d6   :  { %v6683_v0 = vpop.f32.mrb[17].mxu1 }
 0x1d7   :  { %7106 = vmatpush3.bf16.msra.mxu0 %v7103_v27  ;;  %v144_v27 = vld [vmem:[%s8874_s5 + $0x70] sm:$0xff] }
 0x1d8   :  { %v7862_v37 = vpop.f32.mrb[20].mxu0  ;;  %7108 = vmatprep.subr.bf16.mxu0 %v7107_v25 }
 0x1d9   :  { %v7864_v60 = vpop.f32.mrb[18].mxu1  ;;  %v6713_v6 = vpop.f32.mrb[21].mxu0 }
 0x1da   :  { %v6688_v54 = vpop.f32.mrb[19].mxu1  ;;  %v142_v6 = vld [vmem:[%s8874_s5 + $0x60] sm:$0xff] }
 0x1db   :  { %7110 = vmatpush3.bf16.msra.mxu0 %v7107_v25  ;;  %v7111_v54 = vpack.c.bf16 %v143_v50, %v142_v6 }
 0x1dd   :  { %v7866_v0 = vpop.f32.mrb[20].mxu1  ;;  %7112 = vmatprep.subr.bf16.mxu0 %v7111_v54 }
 0x1de   :  { %v6698_v18 = vpop.f32.mrb[21].mxu1 }
 0x1df   :  { %7114 = vmatpush3.bf16.msra.mxu0 %v7111_v54 }
 0x1e1   :  { %v7868_v8 = vpop.f32.mrb[22].mxu1 }
 0x1e2   :  { %v6708_v17 = vpop.f32.mrb[23].mxu1 }
 0x1e5   :  { %v7870_v49 = vpop.f32.mrb[24].mxu1 }
 0x1e6   :  { %v6718_v44 = vpop.f32.mrb[25].mxu1 }
 0x1e7   :  { %v7115_v44 = vpack.c.bf16 %v145_v2, %v144_v27 }
 0x1e9   :  { %7116 = vmatprep.subr.bf16.mxu0 %v7115_v44 }
 0x1ea   :  { %7118 = vmatpush3.bf16.msra.mxu0 %v7115_v44 }
 0x1eb   :  { %6930 = vmatprep.subr.mxu0 %v7247_v22 }
 0x228   :  { %v1583_v31 = vpop.f32.mrb[22].mxu0 }
 0x229   :  { %2758 = vrot.lane.b32.xlu0 %v1583_v31, %s7249_s16  ;;  %v6723_v25 = vpop.f32.mrb[23].mxu0 }
 0x22c   :  { %v1660_v18 = vpop.f32.mrb[26].mxu1  ;;  %v1737_v17 = vpop.f32.mrb[24].mxu0 }
 0x22d   :  { %2760 = vrot.lane.b32.xlu1 %v1660_v18, %s7249_s16  ;;  %v6728_v6 = vpop.f32.mrb[27].mxu1  ;;  %2762 = vrot.lane.b32.xlu0 %v1737_v17, %s7249_s16  ;;  %v6733_v50 = vpop.f32.mrb[25].mxu0 }
 0x230   :  { %v1814_v54 = vpop.f32.mrb[28].mxu1  ;;  %v1891_v40 = vpop.f32.mrb[26].mxu0 }
 0x231   :  { %2764 = vrot.lane.b32.xlu1 %v1814_v54, %s7249_s16  ;;  %v6738_v27 = vpop.f32.mrb[29].mxu1  ;;  %2766 = vrot.lane.b32.xlu0 %v1891_v40, %s7249_s16  ;;  %v6743_v2 = vpop.f32.mrb[27].mxu0 }
 0x234   :  { %v1968_v44 = vpop.f32.mrb[30].mxu1  ;;  %v2045_v36 = vpop.f32.mrb[28].mxu0 }
 0x235   :  { %2768 = vrot.lane.b32.xlu1 %v1968_v44, %s7249_s16  ;;  %2770 = vrot.lane.b32.xlu0 %v2045_v36, %s7249_s16  ;;  %v6748_v31 = vpop.f32.mrb[31].mxu1  ;;  %v6753_v25 = vpop.f32.mrb[29].mxu0 }
 0x238   :  { %v2122_v18 = vpop.f32.mrb[32].mxu1  ;;  %v2199_v6 = vpop.f32.mrb[30].mxu0 }
 0x239   :  { %2772 = vrot.lane.b32.xlu1 %v2122_v18, %s7249_s16  ;;  %2774 = vrot.lane.b32.xlu0 %v2199_v6, %s7249_s16  ;;  %v6758_v17 = vpop.f32.mrb[33].mxu1  ;;  %v6763_v50 = vpop.f32.mrb[31].mxu0 }
 0x23c   :  { %v2276_v54 = vpop.f32.mrb[34].mxu1  ;;  %v2353_v27 = vpop.f32.mrb[32].mxu0 }
 0x23d   :  { %2776 = vrot.lane.b32.xlu1 %v2276_v54, %s7249_s16  ;;  %2778 = vrot.lane.b32.xlu0 %v2353_v27, %s7249_s16  ;;  %v6768_v40 = vpop.f32.mrb[35].mxu1  ;;  %v6773_v2 = vpop.f32.mrb[33].mxu0 }
 0x23e   :  { %v7904_v40 = vld [vmem:[%s8873_s4] ss:$0 sm:$0xff]  ;;  %s7250_s4 = smov 112  }
 0x240   :  { %v2430_v44 = vpop.f32.mrb[36].mxu1  ;;  %v2507_v36 = vpop.f32.mrb[34].mxu0 }
 0x241   :  { %2780 = vrot.lane.b32.xlu1 %v2430_v44, %s7249_s16  ;;  %2782 = vrot.lane.b32.xlu0 %v2507_v36, %s7249_s16  ;;  %v6778_v31 = vpop.f32.mrb[37].mxu1  ;;  %v6783_v25 = vpop.f32.mrb[35].mxu0 }
 0x244   :  { %v2584_v18 = vpop.f32.mrb[38].mxu1  ;;  %v2661_v6 = vpop.f32.mrb[36].mxu0 }
 0x245   :  { %2784 = vrot.lane.b32.xlu1 %v2584_v18, %s7249_s16  ;;  %2786 = vrot.lane.b32.xlu0 %v2661_v6, %s7249_s16  ;;  %v6788_v17 = vpop.f32.mrb[39].mxu1  ;;  %v6793_v50 = vpop.f32.mrb[37].mxu0 }
 0x248   :  { %v2738_v54 = vpop.f32.mrb[40].mxu1 }
 0x249   :  { %2788 = vrot.lane.b32.xlu1 %v2738_v54, %s7249_s16  ;;  %v6798_v27 = vpop.f32.mrb[41].mxu1  ;;  %s7251_s16 = smov 16  }
 0x29b   :  { %v2759_v2 = vpop.permute.xlu0 %2758 }
 0x29c   :  { %v2807_v44 = vsel %vm2806_vm3, %v7804_v43, %v2759_v2 }
 0x29d   :  { %v2829_v36 = vadd.f32 %v7904_v40, %v2807_v44 }
 0x29f   :  { %v2845_v31 = vmax.f32 %v2829_v36, 0.0  ;;  %v2761_v25 = vpop.permute.xlu1 %2760  ;;  %v2763_v18 = vpop.permute.xlu0 %2762 }
 0x2a0   :  { %v2808_v6 = vsel %vm2806_vm3, %v7806_v58, %v2761_v25  ;;  %v2809_v17 = vsel %vm2806_vm3, %v7808_v56, %v2763_v18 }
 0x2a1   :  { %v2830_v50 = vadd.f32 %v7904_v40, %v2808_v6  ;;  %v2831_v54 = vadd.f32 %v7904_v40, %v2809_v17  ;;  %6831 = vmatprep.mubr.f32.mxu0 %v2845_v31 }
 0x2a3   :  { %v2846_v27 = vmax.f32 %v2830_v50, 0.0  ;;  %v2847_v32 = vmax.f32 %v2831_v54, 0.0  ;;  %v2765_v28 = vpop.permute.xlu1 %2764  ;;  %v2767_v43 = vpop.permute.xlu0 %2766 }
 0x2a4   :  { %v2810_v2 = vsel %vm2806_vm3, %v7810_v41, %v2765_v28  ;;  %v2811_v44 = vsel %vm2806_vm3, %v7812_v19, %v2767_v43 }
 0x2a5   :  { %v2832_v58 = vadd.f32 %v7904_v40, %v2810_v2  ;;  %v2833_v36 = vadd.f32 %v7904_v40, %v2811_v44  ;;  %6832 = vmatmul.mubr.f32.vlgmr.msra.gmra.mrb[38].mxu0 %v2846_v27 }
 0x2a6   :  { %6834 = vmatprep.mubr.f32.mxu0 %v2847_v32 }
 0x2a7   :  { %v2848_v56 = vmax.f32 %v2832_v58, 0.0  ;;  %v2849_v25 = vmax.f32 %v2833_v36, 0.0  ;;  %v2769_v18 = vpop.permute.xlu1 %2768  ;;  %v2771_v31 = vpop.permute.xlu0 %2770 }
 0x2a8   :  { %v2812_v6 = vsel %vm2806_vm3, %v7814_v29, %v2769_v18  ;;  %v2813_v17 = vsel %vm2806_vm3, %v7834_v63, %v2771_v31 }
 0x2a9   :  { %v2834_v28 = vadd.f32 %v7904_v40, %v2812_v6  ;;  %v2835_v19 = vadd.f32 %v7904_v40, %v2813_v17  ;;  %6835 = vmatmul.mubr.f32.gmra.mrb[40].mxu0 %v2848_v56 }
 0x2aa   :  { %6837 = vmatprep.mubr.f32.mxu0 %v2849_v25 }
 0x2ab   :  { %v2850_v41 = vmax.f32 %v2834_v28, 0.0  ;;  %v2851_v50 = vmax.f32 %v2835_v19, 0.0  ;;  %v2773_v54 = vpop.permute.xlu1 %2772  ;;  %v2775_v32 = vpop.permute.xlu0 %2774 }
 0x2ac   :  { %v2814_v27 = vsel %vm2806_vm3, %v7844_v59, %v2773_v54  ;;  %v2815_v43 = vsel %vm2806_vm3, %v7854_v13, %v2775_v32 }
 0x2ad   :  { %v2836_v29 = vadd.f32 %v7904_v40, %v2814_v27  ;;  %v2837_v63 = vadd.f32 %v7904_v40, %v2815_v43  ;;  %6838 = vmatmul.mubr.f32.gmra.mrb[42].mxu0 %v2850_v41 }
 0x2ae   :  { %6840 = vmatprep.mubr.f32.mxu0 %v2851_v50 }
 0x2af   :  { %v2852_v2 = vmax.f32 %v2836_v29, 0.0  ;;  %v2853_v44 = vmax.f32 %v2837_v63, 0.0  ;;  %v2777_v58 = vpop.permute.xlu1 %2776  ;;  %v2779_v36 = vpop.permute.xlu0 %2778 }
 0x2b0   :  { %v2816_v56 = vsel %vm2806_vm3, %v7864_v60, %v2777_v58  ;;  %v2817_v25 = vsel %vm2806_vm3, %v7836_v4, %v2779_v36 }
 0x2b1   :  { %v2838_v59 = vadd.f32 %v7904_v40, %v2816_v56  ;;  %v2839_v13 = vadd.f32 %v7904_v40, %v2817_v25  ;;  %6841 = vmatmul.mubr.f32.gmra.mrb[44].mxu0 %v2852_v2  ;;  %v8914_v56 = vcvt.s32.f32 %v7416_v26  ;;  %v8915_v25 = vcvt.s32.f32 %v7429_v30 }
 0x2b2   :  { %6843 = vmatprep.mubr.f32.mxu0 %v2853_v44 }
 0x2b3   :  { %v2854_v18 = vmax.f32 %v2838_v59, 0.0  ;;  %v2855_v31 = vmax.f32 %v2839_v13, 0.0  ;;  %v2781_v6 = vpop.permute.xlu1 %2780  ;;  %v2783_v17 = vpop.permute.xlu0 %2782  ;;  %v8916_v13 = vcvt.s32.f32 %v7443_v34 }
 0x2b4   :  { %v2818_v28 = vsel %vm2806_vm3, %v7866_v0, %v2781_v6  ;;  %v2819_v19 = vsel %vm2806_vm3, %v7852_v12, %v2783_v17  ;;  %v8918_v17 = vcvt.s32.f32 %v7471_v42 }
 0x2b5   :  { %v2840_v60 = vadd.f32 %v7904_v40, %v2818_v28  ;;  %v2841_v4 = vadd.f32 %v7904_v40, %v2819_v19  ;;  %6844 = vmatmul.mubr.f32.gmra.mrb[46].mxu0 %v2854_v18  ;;  %v8919_v19 = vcvt.s32.f32 %v7485_v46  ;;  %v8921_v46 = vcvt.s32.f32 %v7600_v5 }
 0x2b6   :  { %6846 = vmatprep.mubr.f32.mxu0 %v2855_v31  ;;  %v8917_v31 = vcvt.s32.f32 %v7457_v38 }
 0x2b7   :  { %v2856_v41 = vmax.f32 %v2840_v60, 0.0  ;;  %v2857_v50 = vmax.f32 %v2841_v4, 0.0  ;;  %v2785_v54 = vpop.permute.xlu1 %2784  ;;  %v2787_v32 = vpop.permute.xlu0 %2786  ;;  %v8920_v4 = vcvt.s32.f32 %v7505_v52  ;;  %v8923_v52 = vcvt.s32.f32 %v7550_v62 }
 0x2b8   :  { %v2820_v27 = vsel %vm2806_vm3, %v7868_v8, %v2785_v54  ;;  %v2821_v43 = vsel %vm2806_vm3, %v7862_v37, %v2787_v32  ;;  %v8925_v62 = vcvt.s32.f32 %v7568_v1  ;;  %v8927_v1 = vcvt.s32.f32 %v7588_v3 }
 0x2b9   :  { %v2842_v0 = vadd.f32 %v7904_v40, %v2820_v27  ;;  %v2843_v12 = vadd.f32 %v7904_v40, %v2821_v43  ;;  %6847 = vmatmul.mubr.f32.gmra.mrb[48].mxu0 %v2856_v41  ;;  %v8922_v41 = vcvt.s32.f32 %v7528_v57  ;;  %v8924_v57 = vcvt.s32.f32 %v7490_v47 }
 0x2ba   :  { %6849 = vmatprep.mubr.f32.mxu0 %v2857_v50  ;;  %v8926_v47 = vcvt.s32.f32 %v7521_v55  ;;  %v8928_v55 = vcvt.s32.f32 %v7543_v61  ;;  %v8929_v3 = vcvt.s32.f32 %v7624_v9  ;;  %v8930_v54 = vcvt.s32.f32 %v7618_v7 }
 0x2bb   :  { %v2858_v29 = vmax.f32 %v2842_v0, 0.0  ;;  %v2859_v63 = vmax.f32 %v2843_v12, 0.0  ;;  %v2789_v2 = vpop.permute.xlu1 %2788  ;;  %v8931_v9 = vcvt.s32.f32 %v7642_v14  ;;  %v8932_v7 = vcvt.s32.f32 %v7629_v10 }
 0x2bc   :  { %v2822_v44 = vsel %vm2806_vm3, %v7870_v49, %v2789_v2  ;;  %v8933_v14 = vcvt.s32.f32 %v7662_v20  ;;  %v8934_v10 = vcvt.s32.f32 %v7647_v15  ;;  %v8935_v20 = vcvt.s32.f32 %v7686_v33 }
 0x2bd   :  { %v2844_v58 = vadd.f32 %v7904_v40, %v2822_v44  ;;  %6850 = vmatmul.mubr.f32.gmra.mrb[50].mxu0 %v2858_v29  ;;  %v8936_v15 = vcvt.s32.f32 %v7667_v21  ;;  %v8937_v33 = vcvt.s32.f32 %v7710_v45  ;;  %v8938_v21 = vcvt.s32.f32 %v7691_v35 }
 0x2be   :  { %6852 = vmatprep.mubr.f32.mxu0 %v2859_v63  ;;  %v8939_v45 = vcvt.s32.f32 %v7734_v11  ;;  %v8940_v35 = vcvt.s32.f32 %v7715_v48  ;;  %v8941_v11 = vcvt.s32.f32 %v7758_v39  ;;  %v8942_v48 = vcvt.s32.f32 %v7739_v16 }
 0x2bf   :  { %v2860_v8 = vmax.f32 %v2844_v58, 0.0  ;;  %v8943_v39 = vcvt.s32.f32 %v7782_v53  ;;  %v8944_v16 = vcvt.s32.f32 %v7763_v51 }
 0x2c1   :  { %6853 = vmatmul.mubr.f32.gmra.mrb[52].mxu0 %v2860_v8 }
 0x2c2   :  { %6932 = vmatprep.mubr.msk.f32.mxu0 %vm7248_vm1, %v7247_v22 }
 0x378   :  { %v6833_v37 = vpop.f32.mrb[38].mxu0 }
 0x379   :  { %4201 = vrot.lane.b32.xlu1 %v6833_v37, %s7250_s4  ;;  %v2927_v36 = vpop.f32.mrb[39].mxu0 }
 0x37a   :  { %4127 = vrot.lane.b32.xlu0 %v2927_v36, %s7250_s4  ;;  %6856 = vmatpush3.msra.mxu1 %v2927_v36 }
 0x37b   :  { %6858 = vmatmul.mubr.msk.f32.vlgmr.msra.gmra.mrb[42].mxu1 %vm341_vm2, %v77_v24  ;;  %6860 = vmatprep.subr.mxu1 %v7247_v22 }
 0x37c   :  { %v6836_v49 = vpop.f32.mrb[40].mxu0  ;;  %6861 = vmatpush3.msra.mxu1 %v6833_v37  ;;  %6862 = vmatprep.mubr.msk.f32.mxu1 %vm7248_vm1, %v7247_v22 }
 0x37d   :  { %4349 = vrot.lane.b32.xlu1 %v6836_v49, %s7250_s4  ;;  %v2937_v40 = vpop.f32.mrb[41].mxu0  ;;  %6865 = vmatprep.subr.mxu1 %v7247_v22 }
 0x37e   :  { %4275 = vrot.lane.b32.xlu0 %v2937_v40, %s7250_s4 }
 0x37f   :  { %6863 = vmatmul.mubr.msk.f32.vlgmr.msra.gmra.mrb[44].mxu1 %vm341_vm2, %v8914_v56 }
 0x380   :  { %6866 = vmatpush3.msra.mxu1 %v2937_v40  ;;  %v6839_v23 = vpop.f32.mrb[42].mxu0  ;;  %6867 = vmatprep.mubr.msk.f32.mxu1 %vm7248_vm1, %v7247_v22 }
 0x381   :  { %4497 = vrot.lane.b32.xlu1 %v6839_v23, %s7250_s4  ;;  %v2947_v24 = vpop.f32.mrb[43].mxu0  ;;  %6870 = vmatprep.subr.mxu1 %v7247_v22 }
 0x382   :  { %4423 = vrot.lane.b32.xlu0 %v2947_v24, %s7250_s4 }
 0x383   :  { %6868 = vmatmul.mubr.msk.f32.vlgmr.msra.gmra.mrb[46].mxu1 %vm341_vm2, %v8915_v25 }
 0x384   :  { %6871 = vmatpush3.msra.mxu1 %v6836_v49  ;;  %v6842_v26 = vpop.f32.mrb[44].mxu0  ;;  %6872 = vmatprep.mubr.msk.f32.mxu1 %vm7248_vm1, %v7247_v22 }
 0x385   :  { %4645 = vrot.lane.b32.xlu1 %v6842_v26, %s7250_s4  ;;  %v2957_v59 = vpop.f32.mrb[45].mxu0  ;;  %6875 = vmatprep.subr.mxu1 %v7247_v22 }
 0x386   :  { %4571 = vrot.lane.b32.xlu0 %v2957_v59, %s7250_s4 }
 0x387   :  { %6873 = vmatmul.mubr.msk.f32.vlgmr.msra.gmra.mrb[48].mxu1 %vm341_vm2, %v8916_v13 }
 0x388   :  { %6876 = vmatpush3.msra.mxu1 %v2947_v24  ;;  %v6845_v30 = vpop.f32.mrb[46].mxu0  ;;  %6877 = vmatprep.mubr.msk.f32.mxu1 %vm7248_vm1, %v7247_v22 }
 0x389   :  { %4793 = vrot.lane.b32.xlu1 %v6845_v30, %s7250_s4  ;;  %v2967_v18 = vpop.f32.mrb[47].mxu0  ;;  %6880 = vmatprep.subr.mxu1 %v7247_v22 }
 0x38a   :  { %4719 = vrot.lane.b32.xlu0 %v2967_v18, %s7250_s4 }
 0x38b   :  { %6878 = vmatmul.mubr.msk.f32.vlgmr.msra.gmra.mrb[50].mxu1 %vm341_vm2, %v8917_v31 }
 0x38c   :  { %6881 = vmatpush3.msra.mxu1 %v6839_v23  ;;  %v6848_v34 = vpop.f32.mrb[48].mxu0  ;;  %6882 = vmatprep.mubr.msk.f32.mxu1 %vm7248_vm1, %v7247_v22 }
 0x38d   :  { %4941 = vrot.lane.b32.xlu1 %v6848_v34, %s7250_s4  ;;  %v2977_v6 = vpop.f32.mrb[49].mxu0  ;;  %6885 = vmatprep.subr.mxu1 %v7247_v22 }
 0x38e   :  { %4867 = vrot.lane.b32.xlu0 %v2977_v6, %s7250_s4 }
 0x38f   :  { %6883 = vmatmul.mubr.msk.f32.vlgmr.msra.gmra.mrb[52].mxu1 %vm341_vm2, %v8918_v17 }
 0x390   :  { %6886 = vmatpush3.msra.mxu1 %v2957_v59  ;;  %v6851_v38 = vpop.f32.mrb[50].mxu0  ;;  %6887 = vmatprep.mubr.msk.f32.mxu1 %vm7248_vm1, %v7247_v22 }
 0x391   :  { %5089 = vrot.lane.b32.xlu1 %v6851_v38, %s7250_s4  ;;  %v2987_v28 = vpop.f32.mrb[51].mxu0  ;;  %6890 = vmatprep.subr.mxu1 %v7247_v22 }
 0x392   :  { %5015 = vrot.lane.b32.xlu0 %v2987_v28, %s7250_s4 }
 0x393   :  { %6888 = vmatmul.mubr.msk.f32.vlgmr.msra.gmra.mrb[54].mxu1 %vm341_vm2, %v8919_v19 }
 0x394   :  { %6891 = vmatpush3.msra.mxu1 %v6842_v26  ;;  %v6854_v42 = vpop.f32.mrb[52].mxu0  ;;  %6892 = vmatprep.mubr.msk.f32.mxu1 %vm7248_vm1, %v7247_v22 }
 0x395   :  { %5237 = vrot.lane.b32.xlu1 %v6854_v42, %s7250_s4  ;;  %v2997_v60 = vpop.f32.mrb[53].mxu0  ;;  %6931 = vmatpush3.msra.mxu0 %v6854_v42 }
 0x396   :  { %6895 = vmatprep.subr.mxu1 %v7247_v22  ;;  %5163 = vrot.lane.b32.xlu0 %v2997_v60, %s7250_s4 }
 0x397   :  { %6893 = vmatmul.mubr.msk.f32.vlgmr.msra.gmra.mrb[56].mxu1 %vm341_vm2, %v8920_v4  ;;  %6933 = vmatmul.mubr.msk.f32.vlgmr.msra.gmra.mrb[54].mxu0 %vm341_vm2, %v8921_v46 }
 0x398   :  { %6896 = vmatpush3.msra.mxu1 %v2967_v18  ;;  %6897 = vmatprep.mubr.msk.f32.mxu1 %vm7248_vm1, %v7247_v22 }
 0x399   :  { %6900 = vmatprep.subr.mxu1 %v7247_v22  ;;  %6940 = vmatprep.subr.mxu0 %v7247_v22 }
 0x39a   :  { %6942 = vmatprep.mubr.msk.f32.mxu0 %vm7248_vm1, %v7247_v22 }
 0x39b   :  { %6898 = vmatmul.mubr.msk.f32.vlgmr.msra.gmra.mrb[58].mxu1 %vm341_vm2, %v8922_v41 }
 0x39c   :  { %6901 = vmatpush3.msra.mxu1 %v6845_v30  ;;  %6902 = vmatprep.mubr.msk.f32.mxu1 %vm7248_vm1, %v7247_v22 }
 0x39d   :  { %6905 = vmatprep.subr.mxu1 %v7247_v22 }
 0x39f   :  { %6903 = vmatmul.mubr.msk.f32.vlgmr.msra.gmra.mrb[60].mxu1 %vm341_vm2, %v8923_v52 }
 0x3a0   :  { %6906 = vmatpush3.msra.mxu1 %v2977_v6  ;;  %6907 = vmatprep.mubr.msk.f32.mxu1 %vm7248_vm1, %v7247_v22 }
 0x3a1   :  { %6910 = vmatprep.subr.mxu1 %v7247_v22 }
 0x3a3   :  { %6908 = vmatmul.mubr.msk.f32.vlgmr.msra.gmra.mrb[62].mxu1 %vm341_vm2, %v8924_v57 }
 0x3a4   :  { %6911 = vmatpush3.msra.mxu1 %v6848_v34  ;;  %6912 = vmatprep.mubr.msk.f32.mxu1 %vm7248_vm1, %v7247_v22 }
 0x3a5   :  { %6915 = vmatprep.subr.mxu1 %v7247_v22 }
 0x3a7   :  { %6913 = vmatmul.mubr.msk.f32.vlgmr.msra.gmra.mrb[64].mxu1 %vm341_vm2, %v8925_v62 }
 0x3a8   :  { %6916 = vmatpush3.msra.mxu1 %v2987_v28  ;;  %6917 = vmatprep.mubr.msk.f32.mxu1 %vm7248_vm1, %v7247_v22 }
 0x3a9   :  { %6920 = vmatprep.subr.mxu1 %v7247_v22 }
 0x3ab   :  { %6918 = vmatmul.mubr.msk.f32.vlgmr.msra.gmra.mrb[66].mxu1 %vm341_vm2, %v8926_v47 }
 0x3ac   :  { %6921 = vmatpush3.msra.mxu1 %v6851_v38  ;;  %6922 = vmatprep.mubr.msk.f32.mxu1 %vm7248_vm1, %v7247_v22 }
 0x3ad   :  { %6925 = vmatprep.subr.mxu1 %v7247_v22 }
 0x3af   :  { %6923 = vmatmul.mubr.msk.f32.vlgmr.msra.gmra.mrb[68].mxu1 %vm341_vm2, %v8927_v1 }
 0x3b0   :  { %6926 = vmatpush3.msra.mxu1 %v2997_v60  ;;  %6927 = vmatprep.mubr.msk.f32.mxu1 %vm7248_vm1, %v7247_v22 }
 0x3b1   :  { %6935 = vmatprep.subr.mxu1 %v7247_v22 }
 0x3b3   :  { %6928 = vmatmul.mubr.msk.f32.vlgmr.msra.gmra.mrb[70].mxu1 %vm341_vm2, %v8928_v55 }
 0x3b4   :  { %6937 = vmatprep.mubr.msk.f32.mxu1 %vm7248_vm1, %v7247_v22 }
 0x3eb   :  { %v4202_v5 = vpop.permute.xlu1 %4201 }
 0x3ec   :  { %v4128_v50 = vpop.permute.xlu0 %4127  ;;  %6941 = vmatpush3.msra.mxu0 %v4202_v5 }
 0x3ed   :  { %6936 = vmatpush3.msra.mxu1 %v4128_v50  ;;  %6943 = vmatmul.mubr.msk.f32.vlgmr.msra.gmra.mrb[56].mxu0 %vm341_vm2, %v8929_v3 }
 0x3ee   :  { %6938 = vmatmul.mubr.msk.f32.vlgmr.msra.gmra.mrb[72].mxu1 %vm341_vm2, %v8930_v54  ;;  %6950 = vmatprep.subr.mxu0 %v7247_v22 }
 0x3ef   :  { %v4350_v61 = vpop.permute.xlu1 %4349  ;;  %6945 = vmatprep.subr.mxu1 %v7247_v22  ;;  %6952 = vmatprep.mubr.msk.f32.mxu0 %vm7248_vm1, %v7247_v22 }
 0x3f0   :  { %v4276_v32 = vpop.permute.xlu0 %4275  ;;  %6951 = vmatpush3.msra.mxu0 %v4350_v61  ;;  %6947 = vmatprep.mubr.msk.f32.mxu1 %vm7248_vm1, %v7247_v22 }
 0x3f1   :  { %6946 = vmatpush3.msra.mxu1 %v4276_v32  ;;  %6953 = vmatmul.mubr.msk.f32.vlgmr.msra.gmra.mrb[58].mxu0 %vm341_vm2, %v8931_v9 }
 0x3f2   :  { %6948 = vmatmul.mubr.msk.f32.vlgmr.msra.gmra.mrb[74].mxu1 %vm341_vm2, %v8932_v7  ;;  %6960 = vmatprep.subr.mxu0 %v7247_v22 }
 0x3f3   :  { %v4498_v27 = vpop.permute.xlu1 %4497  ;;  %6955 = vmatprep.subr.mxu1 %v7247_v22  ;;  %6962 = vmatprep.mubr.msk.f32.mxu0 %vm7248_vm1, %v7247_v22 }
 0x3f4   :  { %v4424_v43 = vpop.permute.xlu0 %4423  ;;  %6961 = vmatpush3.msra.mxu0 %v4498_v27  ;;  %6957 = vmatprep.mubr.msk.f32.mxu1 %vm7248_vm1, %v7247_v22 }
 0x3f5   :  { %6956 = vmatpush3.msra.mxu1 %v4424_v43  ;;  %6963 = vmatmul.mubr.msk.f32.vlgmr.msra.gmra.mrb[60].mxu0 %vm341_vm2, %v8933_v14 }
 0x3f6   :  { %6958 = vmatmul.mubr.msk.f32.vlgmr.msra.gmra.mrb[76].mxu1 %vm341_vm2, %v8934_v10  ;;  %6970 = vmatprep.subr.mxu0 %v7247_v22 }
 0x3f7   :  { %v4646_v0 = vpop.permute.xlu1 %4645  ;;  %6965 = vmatprep.subr.mxu1 %v7247_v22  ;;  %6972 = vmatprep.mubr.msk.f32.mxu0 %vm7248_vm1, %v7247_v22 }
 0x3f8   :  { %v4572_v12 = vpop.permute.xlu0 %4571  ;;  %6971 = vmatpush3.msra.mxu0 %v4646_v0  ;;  %6967 = vmatprep.mubr.msk.f32.mxu1 %vm7248_vm1, %v7247_v22 }
 0x3f9   :  { %6966 = vmatpush3.msra.mxu1 %v4572_v12  ;;  %6973 = vmatmul.mubr.msk.f32.vlgmr.msra.gmra.mrb[62].mxu0 %vm341_vm2, %v8935_v20 }
 0x3fa   :  { %6968 = vmatmul.mubr.msk.f32.vlgmr.msra.gmra.mrb[78].mxu1 %vm341_vm2, %v8936_v15  ;;  %6980 = vmatprep.subr.mxu0 %v7247_v22 }
 0x3fb   :  { %v4794_v29 = vpop.permute.xlu1 %4793  ;;  %6975 = vmatprep.subr.mxu1 %v7247_v22  ;;  %6982 = vmatprep.mubr.msk.f32.mxu0 %vm7248_vm1, %v7247_v22 }
 0x3fc   :  { %v4720_v63 = vpop.permute.xlu0 %4719  ;;  %6981 = vmatpush3.msra.mxu0 %v4794_v29  ;;  %6977 = vmatprep.mubr.msk.f32.mxu1 %vm7248_vm1, %v7247_v22 }
 0x3fd   :  { %6976 = vmatpush3.msra.mxu1 %v4720_v63  ;;  %6983 = vmatmul.mubr.msk.f32.vlgmr.msra.gmra.mrb[64].mxu0 %vm341_vm2, %v8937_v33 }
 0x3fe   :  { %6978 = vmatmul.mubr.msk.f32.vlgmr.msra.gmra.mrb[80].mxu1 %vm341_vm2, %v8938_v21  ;;  %6990 = vmatprep.subr.mxu0 %v7247_v22 }
 0x3ff   :  { %v4942_v2 = vpop.permute.xlu1 %4941  ;;  %6985 = vmatprep.subr.mxu1 %v7247_v22  ;;  %6992 = vmatprep.mubr.msk.f32.mxu0 %vm7248_vm1, %v7247_v22 }
 0x400   :  { %v4868_v44 = vpop.permute.xlu0 %4867  ;;  %6991 = vmatpush3.msra.mxu0 %v4942_v2  ;;  %6987 = vmatprep.mubr.msk.f32.mxu1 %vm7248_vm1, %v7247_v22 }
 0x401   :  { %6986 = vmatpush3.msra.mxu1 %v4868_v44  ;;  %6993 = vmatmul.mubr.msk.f32.vlgmr.msra.gmra.mrb[66].mxu0 %vm341_vm2, %v8939_v45 }
 0x402   :  { %6988 = vmatmul.mubr.msk.f32.vlgmr.msra.gmra.mrb[82].mxu1 %vm341_vm2, %v8940_v35  ;;  %7000 = vmatprep.subr.mxu0 %v7247_v22 }
 0x403   :  { %v5090_v58 = vpop.permute.xlu1 %5089  ;;  %6995 = vmatprep.subr.mxu1 %v7247_v22  ;;  %7002 = vmatprep.mubr.msk.f32.mxu0 %vm7248_vm1, %v7247_v22 }
 0x404   :  { %v5016_v8 = vpop.permute.xlu0 %5015  ;;  %7001 = vmatpush3.msra.mxu0 %v5090_v58  ;;  %6997 = vmatprep.mubr.msk.f32.mxu1 %vm7248_vm1, %v7247_v22 }
 0x405   :  { %6996 = vmatpush3.msra.mxu1 %v5016_v8  ;;  %7003 = vmatmul.mubr.msk.f32.vlgmr.msra.gmra.mrb[68].mxu0 %vm341_vm2, %v8941_v11 }
 0x406   :  { %6998 = vmatmul.mubr.msk.f32.vlgmr.msra.gmra.mrb[84].mxu1 %vm341_vm2, %v8942_v48  ;;  %7010 = vmatprep.subr.mxu0 %v7247_v22 }
 0x407   :  { %v5238_v37 = vpop.permute.xlu1 %5237  ;;  %7012 = vmatprep.mubr.msk.f32.mxu0 %vm7248_vm1, %v7247_v22  ;;  %7005 = vmatprep.subr.mxu1 %v7247_v22 }
 0x408   :  { %7011 = vmatpush3.msra.mxu0 %v5238_v37  ;;  %v5164_v36 = vpop.permute.xlu0 %5163  ;;  %7007 = vmatprep.mubr.msk.f32.mxu1 %vm7248_vm1, %v7247_v22 }
 0x409   :  { %7006 = vmatpush3.msra.mxu1 %v5164_v36  ;;  %7013 = vmatmul.mubr.msk.f32.vlgmr.msra.gmra.mrb[70].mxu0 %vm341_vm2, %v8943_v39 }
 0x40a   :  { %7008 = vmatmul.mubr.msk.f32.vlgmr.msra.gmra.mrb[86].mxu1 %vm341_vm2, %v8944_v16 }
 0x44e   :  { %v8158_v49 = vpop.f32.mrb[42].mxu1 }
 0x44f   :  { %v6859_v40 = vpop.f32.mrb[43].mxu1 }
 0x450   :  { %v8209_v40 = vld [vmem:[%s8875_s6] ss:$0 sm:$0xff] }
 0x452   :  { %v8160_v56 = vpop.f32.mrb[44].mxu1 }
 0x453   :  { %v6864_v23 = vpop.f32.mrb[45].mxu1 }
 0x456   :  { %v8162_v24 = vpop.f32.mrb[46].mxu1 }
 0x457   :  { %v6869_v25 = vpop.f32.mrb[47].mxu1 }
 0x45a   :  { %v8164_v26 = vpop.f32.mrb[48].mxu1 }
 0x45b   :  { %v6874_v22 = vpop.f32.mrb[49].mxu1 }
 0x45e   :  { %v8166_v59 = vpop.f32.mrb[50].mxu1 }
 0x45f   :  { %v6879_v53 = vpop.f32.mrb[51].mxu1 }
 0x462   :  { %v8168_v13 = vpop.f32.mrb[52].mxu1 }
 0x463   :  { %v6884_v51 = vpop.f32.mrb[53].mxu1 }
 0x466   :  { %v8170_v30 = vpop.f32.mrb[54].mxu1 }
 0x467   :  { %v6889_v18 = vpop.f32.mrb[55].mxu1 }
 0x46a   :  { %v8172_v31 = vpop.f32.mrb[56].mxu1  ;;  %v8174_v34 = vpop.f32.mrb[54].mxu0 }
 0x46b   :  { %v6894_v6 = vpop.f32.mrb[57].mxu1  ;;  %v6934_v17 = vpop.f32.mrb[55].mxu0 }
 0x46e   :  { %v8176_v38 = vpop.f32.mrb[58].mxu1 }
 0x46f   :  { %v6899_v28 = vpop.f32.mrb[59].mxu1 }
 0x472   :  { %v8178_v19 = vpop.f32.mrb[60].mxu1 }
 0x473   :  { %v6904_v42 = vpop.f32.mrb[61].mxu1 }
 0x476   :  { %v8180_v60 = vpop.f32.mrb[62].mxu1 }
 0x477   :  { %v6909_v4 = vpop.f32.mrb[63].mxu1 }
 0x47a   :  { %v8182_v46 = vpop.f32.mrb[64].mxu1 }
 0x47b   :  { %v6914_v41 = vpop.f32.mrb[65].mxu1 }
 0x47e   :  { %v8184_v52 = vpop.f32.mrb[66].mxu1 }
 0x47f   :  { %v6919_v57 = vpop.f32.mrb[67].mxu1 }
 0x482   :  { %v8186_v62 = vpop.f32.mrb[68].mxu1 }
 0x483   :  { %v6924_v47 = vpop.f32.mrb[69].mxu1 }
 0x486   :  { %v8188_v1 = vpop.f32.mrb[70].mxu1 }
 0x487   :  { %v6929_v55 = vpop.f32.mrb[71].mxu1 }
 0x4c0   :  { %v4270_v5 = vpop.f32.mrb[56].mxu0 }
 0x4c1   :  { %5328 = vrot.lane.b32.xlu1 %v4270_v5, %s7251_s16  ;;  %v4196_v50 = vpop.f32.mrb[72].mxu1  ;;  %v6944_v3 = vpop.f32.mrb[57].mxu0 }
 0x4c2   :  { %5326 = vrot.lane.b32.xlu0 %v4196_v50, %s7251_s16  ;;  %v6939_v54 = vpop.f32.mrb[73].mxu1 }
 0x4c4   :  { %v4418_v61 = vpop.f32.mrb[58].mxu0 }
 0x4c5   :  { %5332 = vrot.lane.b32.xlu1 %v4418_v61, %s7251_s16  ;;  %v4344_v32 = vpop.f32.mrb[74].mxu1  ;;  %v6954_v9 = vpop.f32.mrb[59].mxu0 }
 0x4c6   :  { %5330 = vrot.lane.b32.xlu0 %v4344_v32, %s7251_s16  ;;  %v6949_v7 = vpop.f32.mrb[75].mxu1 }
 0x4c8   :  { %v4566_v27 = vpop.f32.mrb[60].mxu0 }
 0x4c9   :  { %5336 = vrot.lane.b32.xlu1 %v4566_v27, %s7251_s16  ;;  %v4492_v43 = vpop.f32.mrb[76].mxu1  ;;  %v6964_v14 = vpop.f32.mrb[61].mxu0 }
 0x4ca   :  { %5334 = vrot.lane.b32.xlu0 %v4492_v43, %s7251_s16  ;;  %v6959_v10 = vpop.f32.mrb[77].mxu1 }
 0x4cc   :  { %v4714_v0 = vpop.f32.mrb[62].mxu0 }
 0x4cd   :  { %5340 = vrot.lane.b32.xlu1 %v4714_v0, %s7251_s16  ;;  %v4640_v12 = vpop.f32.mrb[78].mxu1  ;;  %v6974_v20 = vpop.f32.mrb[63].mxu0 }
 0x4ce   :  { %5338 = vrot.lane.b32.xlu0 %v4640_v12, %s7251_s16  ;;  %v6969_v15 = vpop.f32.mrb[79].mxu1 }
 0x4d0   :  { %v4862_v29 = vpop.f32.mrb[64].mxu0 }
 0x4d1   :  { %5344 = vrot.lane.b32.xlu1 %v4862_v29, %s7251_s16  ;;  %v4788_v63 = vpop.f32.mrb[80].mxu1  ;;  %v6984_v33 = vpop.f32.mrb[65].mxu0 }
 0x4d2   :  { %5342 = vrot.lane.b32.xlu0 %v4788_v63, %s7251_s16  ;;  %v6979_v21 = vpop.f32.mrb[81].mxu1 }
 0x4d4   :  { %v5010_v2 = vpop.f32.mrb[66].mxu0 }
 0x4d5   :  { %5348 = vrot.lane.b32.xlu1 %v5010_v2, %s7251_s16  ;;  %v4936_v44 = vpop.f32.mrb[82].mxu1  ;;  %v6994_v45 = vpop.f32.mrb[67].mxu0 }
 0x4d6   :  { %5346 = vrot.lane.b32.xlu0 %v4936_v44, %s7251_s16  ;;  %v6989_v35 = vpop.f32.mrb[83].mxu1 }
 0x4d8   :  { %v5158_v58 = vpop.f32.mrb[68].mxu0 }
 0x4d9   :  { %5352 = vrot.lane.b32.xlu1 %v5158_v58, %s7251_s16  ;;  %v5084_v8 = vpop.f32.mrb[84].mxu1  ;;  %v7004_v11 = vpop.f32.mrb[69].mxu0 }
 0x4da   :  { %5350 = vrot.lane.b32.xlu0 %v5084_v8, %s7251_s16  ;;  %v6999_v48 = vpop.f32.mrb[85].mxu1 }
 0x4dc   :  { %v5306_v37 = vpop.f32.mrb[70].mxu0 }
 0x4dd   :  { %5356 = vrot.lane.b32.xlu1 %v5306_v37, %s7251_s16  ;;  %v5232_v36 = vpop.f32.mrb[86].mxu1  ;;  %v7014_v39 = vpop.f32.mrb[71].mxu0 }
 0x4de   :  { %5354 = vrot.lane.b32.xlu0 %v5232_v36, %s7251_s16  ;;  %v7009_v16 = vpop.f32.mrb[87].mxu1 }
 0x533   :  { %v5329_v23 = vpop.permute.xlu1 %5328 }
 0x534   :  { %v5376_v25 = vsel %vm5374_vm4, %v8160_v56, %v5329_v23  ;;  %v5327_v22 = vpop.permute.xlu0 %5326 }
 0x535   :  { %v5375_v53 = vsel %vm5374_vm4, %v8158_v49, %v5327_v22  ;;  %v8216_v51 = vadd.f32 %v8209_v40, %v5376_v25 }
 0x536   :  { %v8219_v18 = vadd.f32 %v8209_v40, %v5375_v53 }
 0x537   :  { %v5333_v6 = vpop.permute.xlu1 %5332  ;;  %v5416_v17 = vsel %vm147_vm0, %v8216_v51, 0.0 }
 0x538   :  { %5417 = vadd.xlane.f32.xlu1 %v5416_v17  ;;  %v5331_v28 = vpop.permute.xlu0 %5330  ;;  %v5413_v42 = vsel %vm147_vm0, %v8219_v18, 0.0  ;;  %v5378_v56 = vsel %vm5374_vm4, %v8164_v26, %v5333_v6 }
 0x539   :  { %v5377_v49 = vsel %vm5374_vm4, %v8162_v24, %v5331_v28  ;;  %5414 = vadd.xlane.f32.xlu0 %v5413_v42  ;;  %v8235_v55 = vadd.f32 %v8209_v40, %v5378_v56 }
 0x53a   :  { %v8230_v4 = vadd.f32 %v8209_v40, %v5377_v49 }
 0x53b   :  { %v5337_v41 = vpop.permute.xlu1 %5336  ;;  %v5422_v61 = vsel %vm147_vm0, %v8235_v55, 0.0 }
 0x53c   :  { %v5335_v57 = vpop.permute.xlu0 %5334  ;;  %v5419_v47 = vsel %vm147_vm0, %v8230_v4, 0.0  ;;  %v5380_v5 = vsel %vm5374_vm4, %v8168_v13, %v5337_v41 }
 0x53d   :  { %v5379_v26 = vsel %vm5374_vm4, %v8166_v59, %v5335_v57  ;;  %5420 = vadd.xlane.f32.xlu0 %v5419_v47  ;;  %v8249_v32 = vadd.f32 %v8209_v40, %v5380_v5 }
 0x53e   :  { %v8242_v24 = vadd.f32 %v8209_v40, %v5379_v26 }
 0x53f   :  { %v5341_v50 = vpop.permute.xlu1 %5340  ;;  %v5428_v14 = vsel %vm147_vm0, %v8249_v32, 0.0 }
 0x540   :  { %v5339_v3 = vpop.permute.xlu0 %5338  ;;  %v5425_v54 = vsel %vm147_vm0, %v8242_v24, 0.0  ;;  %v5382_v13 = vsel %vm5374_vm4, %v8172_v31, %v5341_v50 }
 0x541   :  { %v5381_v59 = vsel %vm5374_vm4, %v8170_v30, %v5339_v3  ;;  %5426 = vadd.xlane.f32.xlu1 %v5425_v54  ;;  %5423 = vadd.xlane.f32.xlu0 %v5422_v61  ;;  %v8263_v10 = vadd.f32 %v8209_v40, %v5382_v13 }
 0x542   :  { %v8256_v9 = vadd.f32 %v8209_v40, %v5381_v59 }
 0x543   :  { %v5345_v7 = vpop.permute.xlu1 %5344  ;;  %v5434_v29 = vsel %vm147_vm0, %v8263_v10, 0.0 }
 0x544   :  { %v5343_v27 = vpop.permute.xlu0 %5342  ;;  %v5431_v43 = vsel %vm147_vm0, %v8256_v9, 0.0  ;;  %v5384_v31 = vsel %vm5374_vm4, %v8178_v19, %v5345_v7 }
 0x545   :  { %v5383_v30 = vsel %vm5374_vm4, %v8176_v38, %v5343_v27  ;;  %5432 = vadd.xlane.f32.xlu1 %v5431_v43  ;;  %5429 = vadd.xlane.f32.xlu0 %v5428_v14  ;;  %v8277_v63 = vadd.f32 %v8209_v40, %v5384_v31 }
 0x546   :  { %v8270_v0 = vadd.f32 %v8209_v40, %v5383_v30 }
 0x547   :  { %v5349_v12 = vpop.permute.xlu1 %5348  ;;  %v5440_v45 = vsel %vm147_vm0, %v8277_v63, 0.0 }
 0x548   :  { %v5347_v20 = vpop.permute.xlu0 %5346  ;;  %v5437_v15 = vsel %vm147_vm0, %v8270_v0, 0.0  ;;  %v5386_v19 = vsel %vm5374_vm4, %v8182_v46, %v5349_v12 }
 0x549   :  { %v5385_v38 = vsel %vm5374_vm4, %v8180_v60, %v5347_v20  ;;  %5438 = vadd.xlane.f32.xlu1 %v5437_v15  ;;  %5435 = vadd.xlane.f32.xlu0 %v5434_v29  ;;  %v8291_v35 = vadd.f32 %v8209_v40, %v5386_v19 }
 0x54a   :  { %v8284_v33 = vadd.f32 %v8209_v40, %v5385_v38 }
 0x54b   :  { %v5353_v21 = vpop.permute.xlu1 %5352  ;;  %v5446_v37 = vsel %vm147_vm0, %v8291_v35, 0.0 }
 0x54c   :  { %v5351_v2 = vpop.permute.xlu0 %5350  ;;  %v5443_v44 = vsel %vm147_vm0, %v8284_v33, 0.0  ;;  %v5388_v46 = vsel %vm5374_vm4, %v8186_v62, %v5353_v21 }
 0x54d   :  { %v5387_v60 = vsel %vm5374_vm4, %v8184_v52, %v5351_v2  ;;  %5444 = vadd.xlane.f32.xlu1 %v5443_v44  ;;  %5441 = vadd.xlane.f32.xlu0 %v5440_v45  ;;  %v8305_v36 = vadd.f32 %v8209_v40, %v5388_v46 }
 0x54e   :  { %v8298_v58 = vadd.f32 %v8209_v40, %v5387_v60 }
 0x54f   :  { %v5357_v8 = vpop.permute.xlu1 %5356  ;;  %v5452_v16 = vsel %vm147_vm0, %v8305_v36, 0.0 }
 0x550   :  { %v5355_v11 = vpop.permute.xlu0 %5354  ;;  %v5449_v48 = vsel %vm147_vm0, %v8298_v58, 0.0  ;;  %v5390_v62 = vsel %vm5374_vm4, %v8174_v34, %v5357_v8 }
 0x551   :  { %v5389_v52 = vsel %vm5374_vm4, %v8188_v1, %v5355_v11  ;;  %5450 = vadd.xlane.f32.xlu1 %v5449_v48  ;;  %5447 = vadd.xlane.f32.xlu0 %v5446_v37  ;;  %v8319_v25 = vadd.f32 %v8209_v40, %v5390_v62 }
 0x552   :  { %v8312_v39 = vadd.f32 %v8209_v40, %v5389_v52 }
 0x553   :  { %v5458_v34 = vsel %vm147_vm0, %v8319_v25, 0.0 }
 0x554   :  { %v5455_v23 = vsel %vm147_vm0, %v8312_v39, 0.0 }
 0x555   :  { %5453 = vadd.xlane.f32.xlu0 %v5452_v16  ;;  %5456 = vadd.xlane.f32.xlu1 %v5455_v23 }
 0x559   :  { %5459 = vadd.xlane.f32.xlu0 %v5458_v34 }
 0x5c5   :  { %v5418_v1 = vpop.xlane.xlu1 %5417 }
 0x5c6   :  { %v5463_v22 = vmul.f32 0.03125, %v5418_v1  ;;  %v5415_v53 = vpop.xlane.xlu0 %5414 }
 0x5c7   :  { %v5462_v6 = vmul.f32 0.03125, %v5415_v53 }
 0x5c8   :  { %v8324_v17 = vsub.f32 %v8216_v51, %v5463_v22 }
 0x5c9   :  { %v8327_v28 = vsub.f32 %v8219_v18, %v5462_v6 }
 0x5ca   :  { %v5421_v42 = vpop.xlane.xlu0 %5420  ;;  %v5495_v40 = vmul.f32 %v8324_v17, %v8324_v17 }
 0x5cb   :  { %v5464_v56 = vmul.f32 0.03125, %v5421_v42  ;;  %v5494_v49 = vmul.f32 %v8327_v28, %v8327_v28 }
 0x5cc   :  { %v5513_v41 = vsel %vm147_vm0, %v5495_v40, 0.0 }
 0x5cd   :  { %v8335_v57 = vsub.f32 %v8230_v4, %v5464_v56  ;;  %5514 = vadd.xlane.f32.xlu0 %v5513_v41  ;;  %v5510_v51 = vsel %vm147_vm0, %v5494_v49, 0.0 }
 0x5ce   :  { %v5427_v47 = vpop.xlane.xlu1 %5426  ;;  %5511 = vadd.xlane.f32.xlu1 %v5510_v51  ;;  %v5424_v18 = vpop.xlane.xlu0 %5423 }
 0x5cf   :  { %v5466_v5 = vmul.f32 0.03125, %v5427_v47  ;;  %v5465_v26 = vmul.f32 0.03125, %v5424_v18  ;;  %v5496_v50 = vmul.f32 %v8335_v57, %v8335_v57 }
 0x5d1   :  { %v8341_v3 = vsub.f32 %v8242_v24, %v5466_v5  ;;  %v8344_v54 = vsub.f32 %v8235_v55, %v5465_v26  ;;  %v5516_v4 = vsel %vm147_vm0, %v5496_v50, 0.0 }
 0x5d2   :  { %v5433_v61 = vpop.xlane.xlu1 %5432  ;;  %5517 = vadd.xlane.f32.xlu1 %v5516_v4  ;;  %v5430_v13 = vpop.xlane.xlu0 %5429 }
 0x5d3   :  { %v5468_v59 = vmul.f32 0.03125, %v5433_v61  ;;  %v5467_v7 = vmul.f32 0.03125, %v5430_v13  ;;  %v5498_v27 = vmul.f32 %v8341_v3, %v8341_v3  ;;  %v5497_v43 = vmul.f32 %v8344_v54, %v8344_v54  ;;  %v5797_v13 = vld [vmem:[%s8878_s9] sm:$0xff] }
 0x5d5   :  { %v8352_v14 = vsub.f32 %v8256_v9, %v5468_v59  ;;  %v8355_v24 = vsub.f32 %v8249_v32, %v5467_v7  ;;  %v5522_v31 = vsel %vm147_vm0, %v5498_v27, 0.0  ;;  %v5519_v30 = vsel %vm147_vm0, %v5497_v43, 0.0  ;;  %v5799_v7 = vld [vmem:[%s8878_s9 + $0x10] sm:$0xff]  ;;  %v5800_v27 = vld [vmem:[%s8878_s9 + $0x18] sm:$0xff] }
 0x5d6   :  { %v5439_v55 = vpop.xlane.xlu1 %5438  ;;  %v5436_v12 = vpop.xlane.xlu0 %5435  ;;  %5523 = vadd.xlane.f32.xlu1 %v5522_v31  ;;  %5520 = vadd.xlane.f32.xlu0 %v5519_v30  ;;  %v7123_v43 = vpack.c.bf16 %v5800_v27, %v5799_v7  ;;  %v6018_v31 = vld [vmem:[%s8880_s11 + $0x8] sm:$0xff] }
 0x5d7   :  { %v5470_v20 = vmul.f32 0.03125, %v5439_v55  ;;  %v5469_v15 = vmul.f32 0.03125, %v5436_v12  ;;  %v5500_v29 = vmul.f32 %v8352_v14, %v8352_v14  ;;  %v5499_v9 = vmul.f32 %v8355_v24, %v8355_v24  ;;  %v6017_v55 = vld [vmem:[%s8880_s11] sm:$0xff] }
 0x5d8   :  { %v7127_v30 = vpack.c.bf16 %v6018_v31, %v6017_v55 }
 0x5d9   :  { %v8364_v19 = vsub.f32 %v8270_v0, %v5470_v20  ;;  %v8367_v32 = vsub.f32 %v8263_v10, %v5469_v15  ;;  %v5528_v21 = vsel %vm147_vm0, %v5500_v29, 0.0  ;;  %v5525_v2 = vsel %vm147_vm0, %v5499_v9, 0.0 }
 0x5da   :  { %v5445_v38 = vpop.xlane.xlu1 %5444  ;;  %v5442_v44 = vpop.xlane.xlu0 %5441  ;;  %5529 = vadd.xlane.f32.xlu1 %v5528_v21  ;;  %5526 = vadd.xlane.f32.xlu0 %v5525_v2  ;;  %v8440_v21 = vld [vmem:[%s8876_s7] ss:$0 sm:$0xff] }
 0x5db   :  { %v5472_v45 = vmul.f32 0.03125, %v5445_v38  ;;  %v5471_v46 = vmul.f32 0.03125, %v5442_v44  ;;  %v5502_v60 = vmul.f32 %v8364_v19, %v8364_v19  ;;  %v5501_v0 = vmul.f32 %v8367_v32, %v8367_v32  ;;  %7128 = vmatprep.subr.bf16.mxu0 %v7127_v30 }
 0x5dc   :  { %7130 = vmatpush3.bf16.msra.mxu0 %v7127_v30  ;;  %v8444_v2 = vmul.f32 %v8440_v21, %v8324_v17  ;;  %v8464_v17 = vmul.f32 %v8440_v21, %v8344_v54 }
 0x5dd   :  { %v8376_v8 = vsub.f32 %v8284_v33, %v5472_v45  ;;  %v8379_v10 = vsub.f32 %v8277_v63, %v5471_v46  ;;  %v5534_v48 = vsel %vm147_vm0, %v5502_v60, 0.0  ;;  %v5531_v37 = vsel %vm147_vm0, %v5501_v0, 0.0 }
 0x5de   :  { %v5451_v11 = vpop.xlane.xlu1 %5450  ;;  %v5448_v62 = vpop.xlane.xlu0 %5447  ;;  %5535 = vadd.xlane.f32.xlu1 %v5534_v48  ;;  %5532 = vadd.xlane.f32.xlu0 %v5531_v37  ;;  %v8448_v46 = vmul.f32 %v8440_v21, %v8327_v28  ;;  %v8452_v60 = vmul.f32 %v8440_v21, %v8335_v57  ;;  %v8460_v48 = vmul.f32 %v8440_v21, %v8341_v3 }
 0x5df   :  { %v5474_v52 = vmul.f32 0.03125, %v5451_v11  ;;  %v5473_v16 = vmul.f32 0.03125, %v5448_v62  ;;  %v5504_v23 = vmul.f32 %v8376_v8, %v8376_v8  ;;  %v5503_v33 = vmul.f32 %v8379_v10, %v8379_v10 }
 0x5e0   :  { %v8468_v28 = vmul.f32 %v8440_v21, %v8352_v14  ;;  %v8472_v57 = vmul.f32 %v8440_v21, %v8355_v24  ;;  %v8476_v62 = vmul.f32 %v8440_v21, %v8364_v19  ;;  %v8480_v3 = vmul.f32 %v8440_v21, %v8367_v32 }
 0x5e1   :  { %v8388_v34 = vsub.f32 %v8298_v58, %v5474_v52  ;;  %v8391_v63 = vsub.f32 %v8291_v35, %v5473_v16  ;;  %v5540_v22 = vsel %vm147_vm0, %v5504_v23, 0.0  ;;  %v5537_v53 = vsel %vm147_vm0, %v5503_v33, 0.0 }
 0x5e2   :  { %v5457_v1 = vpop.xlane.xlu1 %5456  ;;  %v5454_v6 = vpop.xlane.xlu0 %5453  ;;  %5541 = vadd.xlane.f32.xlu1 %v5540_v22  ;;  %5538 = vadd.xlane.f32.xlu0 %v5537_v53  ;;  %v8484_v54 = vmul.f32 %v8440_v21, %v8376_v8  ;;  %v8489_v24 = vmul.f32 %v8440_v21, %v8379_v10 }
 0x5e3   :  { %v5476_v42 = vmul.f32 0.03125, %v5457_v1  ;;  %v5475_v40 = vmul.f32 0.03125, %v5454_v6  ;;  %v5506_v56 = vmul.f32 %v8388_v34, %v8388_v34  ;;  %v5505_v58 = vmul.f32 %v8391_v63, %v8391_v63 }
 0x5e5   :  { %v8400_v49 = vsub.f32 %v8312_v39, %v5476_v42  ;;  %v8403_v35 = vsub.f32 %v8305_v36, %v5475_v40  ;;  %v5546_v41 = vsel %vm147_vm0, %v5506_v56, 0.0  ;;  %v5543_v51 = vsel %vm147_vm0, %v5505_v58, 0.0 }
 0x5e6   :  { %v5460_v47 = vpop.xlane.xlu0 %5459  ;;  %5547 = vadd.xlane.f32.xlu1 %v5546_v41  ;;  %5544 = vadd.xlane.f32.xlu0 %v5543_v51 }
 0x5e7   :  { %v5477_v18 = vmul.f32 0.03125, %v5460_v47  ;;  %v5508_v5 = vmul.f32 %v8400_v49, %v8400_v49  ;;  %v5507_v26 = vmul.f32 %v8403_v35, %v8403_v35 }
 0x5e9   :  { %v8412_v39 = vsub.f32 %v8319_v25, %v5477_v18  ;;  %v5552_v36 = vsel %vm147_vm0, %v5508_v5, 0.0  ;;  %v5549_v50 = vsel %vm147_vm0, %v5507_v26, 0.0  ;;  %v5798_v25 = vld [vmem:[%s8878_s9 + $0x8] sm:$0xff] }
 0x5ea   :  { %5553 = vadd.xlane.f32.xlu1 %v5552_v36  ;;  %5550 = vadd.xlane.f32.xlu0 %v5549_v50  ;;  %v7119_v59 = vpack.c.bf16 %v5798_v25, %v5797_v13 }
 0x5eb   :  { %v5509_v4 = vmul.f32 %v8412_v39, %v8412_v39 }
 0x5ec   :  { %7120 = vmatprep.subr.bf16.mxu1 %v7119_v59 }
 0x5ed   :  { %v5555_v61 = vsel %vm147_vm0, %v5509_v4, 0.0  ;;  %7122 = vmatpush3.bf16.msra.mxu1 %v7119_v59 }
 0x5ee   :  { %5556 = vadd.xlane.f32.xlu0 %v5555_v61  ;;  %7124 = vmatprep.subr.bf16.mxu1 %v7123_v43 }
 0x5f1   :  { %7126 = vmatpush3.bf16.msra.mxu1 %v7123_v43 }
 0x65a   :  { %v5515_v12 = vpop.xlane.xlu0 %5514 }
 0x65b   :  { %v5560_v20 = vmul.f32 0.032258064, %v5515_v12  ;;  %v5512_v15 = vpop.xlane.xlu1 %5511 }
 0x65c   :  { %v5559_v29 = vmul.f32 0.032258064, %v5512_v15 }
 0x65d   :  { %7143 = vrsqrt.f32 %v5560_v20  ;;  %vm5584_vm5 = vcmp.eq.f32.partialorder %v5560_v20, inf  ;;  %v5587_v23 = vand.u32 2147483648, %v5560_v20  ;;  %vm5586_vm6 = vcmp.eq.f32.partialorder %v5560_v20, 0.0 }
 0x65e   :  { %7145 = vrsqrt.f32 %v5559_v29  ;;  %vm5577_vm7 = vcmp.eq.f32.partialorder %v5559_v29, inf  ;;  %v5580_v22 = vand.u32 2147483648, %v5559_v29  ;;  %vm5579_vm8 = vcmp.eq.f32.partialorder %v5559_v29, 0.0 }
 0x65f   :  { %v5518_v9 = vpop.xlane.xlu1 %5517 }
 0x660   :  { %v5561_v38 = vmul.f32 0.032258064, %v5518_v9 }
 0x662   :  { %7147 = vrsqrt.f32 %v5561_v38  ;;  %vm5591_vm9 = vcmp.eq.f32.partialorder %v5561_v38, inf  ;;  %vm5593_vm10 = vcmp.eq.f32.partialorder %v5561_v38, 0.0  ;;  %v5594_v40 = vand.u32 2147483648, %v5561_v38 }
 0x663   :  { %v5524_v44 = vpop.xlane.xlu1 %5523  ;;  %v5521_v45 = vpop.xlane.xlu0 %5520 }
 0x664   :  { %v8454_v0 = vmul.f32 0.032258064, %v5524_v44  ;;  %v8456_v11 = vmul.f32 0.032258064, %v5521_v45 }
 0x666   :  { %7149 = vrsqrt.f32 %v8454_v0  ;;  %vm5605_vm11 = vcmp.eq.f32.partialorder %v8454_v0, inf  ;;  %vm5607_vm12 = vcmp.eq.f32.partialorder %v8454_v0, 0.0  ;;  %v5608_v47 = vand.u32 2147483648, %v8454_v0 }
 0x667   :  { %v7144_v37 = vpop.eup %7143  ;;  %7151 = vrsqrt.f32 %v8456_v11  ;;  %v5530_v19 = vpop.xlane.xlu1 %5529  ;;  %vm5598_vm13 = vcmp.eq.f32.partialorder %v8456_v11, inf  ;;  %vm5600_vm14 = vcmp.eq.f32.partialorder %v8456_v11, 0.0  ;;  %v5601_v4 = vand.u32 2147483648, %v8456_v11 }
 0x668   :  { %v7146_v14 = vpop.eup %7145  ;;  %v5583_v52 = vmul.f32 %v7144_v37, %v5560_v20  ;;  %v5527_v16 = vpop.xlane.xlu0 %5526  ;;  %v8492_v33 = vmul.f32 0.032258064, %v5530_v19 }
 0x669   :  { %v5576_v32 = vmul.f32 %v7146_v14, %v5559_v29  ;;  %v8494_v1 = vmul.f32 0.032258064, %v5527_v16 }
 0x66a   :  { %v5585_v8 = vsel %vm5584_vm5, %v5560_v20, %v5583_v52  ;;  %7153 = vrsqrt.f32 %v8492_v33  ;;  %vm5619_vm15 = vcmp.eq.f32.partialorder %v8492_v33, inf  ;;  %vm5621_vm1 = vcmp.eq.f32.partialorder %v8492_v33, 0.0 }
 0x66b   :  { %v5588_v53 = vsel %vm5586_vm6, %v5587_v23, %v5585_v8  ;;  %v5578_v6 = vsel %vm5577_vm7, %v5559_v29, %v5576_v32  ;;  %v5536_v56 = vpop.xlane.xlu1 %5535  ;;  %7155 = vrsqrt.f32 %v8494_v1  ;;  %v5622_v59 = vand.u32 2147483648, %v8492_v33 }
 0x66c   :  { %v7148_v10 = vpop.eup %7147  ;;  %v5581_v42 = vsel %vm5579_vm8, %v5580_v22, %v5578_v6  ;;  %v5533_v58 = vpop.xlane.xlu0 %5532  ;;  %v5688_v51 = vadd.f32 1e-06, %v5588_v53  ;;  %v8502_v18 = vmul.f32 0.032258064, %v5536_v56  ;;  %vm5612_vm2 = vcmp.eq.f32.partialorder %v8494_v1, inf }
 0x66d   :  { %v5590_v41 = vmul.f32 %v7148_v10, %v5561_v38  ;;  %v5687_v5 = vadd.f32 1e-06, %v5581_v42  ;;  %v8505_v36 = vmul.f32 0.032258064, %v5533_v58  ;;  %vm5614_vm3 = vcmp.eq.f32.partialorder %v8494_v1, 0.0 }
 0x66e   :  { %7157 = vrsqrt.f32 %v8502_v18  ;;  %v5615_v20 = vand.u32 2147483648, %v8494_v1  ;;  %vm5633_vm4 = vcmp.eq.f32.partialorder %v8502_v18, inf  ;;  %vm5635_vm5 = vcmp.eq.f32.partialorder %v8502_v18, 0.0 }
 0x66f   :  { %v5592_v26 = vsel %vm5591_vm9, %v5561_v38, %v5590_v41  ;;  %v5542_v61 = vpop.xlane.xlu1 %5541  ;;  %7159 = vrsqrt.f32 %v8505_v36  ;;  %v5636_v45 = vand.u32 2147483648, %v8502_v18  ;;  %vm5626_vm6 = vcmp.eq.f32.partialorder %v8505_v36, inf }
 0x670   :  { %v5595_v50 = vsel %vm5593_vm10, %v5594_v40, %v5592_v26  ;;  %v5539_v13 = vpop.xlane.xlu0 %5538  ;;  %v7150_v25 = vpop.eup %7149  ;;  %7161 = vrcp.f32 %v5688_v51  ;;  %v8517_v43 = vmul.f32 0.032258064, %v5542_v61  ;;  %vm5628_vm7 = vcmp.eq.f32.partialorder %v8505_v36, 0.0 }
 0x671   :  { %v7152_v7 = vpop.eup %7151  ;;  %v5604_v27 = vmul.f32 %v7150_v25, %v8454_v0  ;;  %7163 = vrcp.f32 %v5687_v5  ;;  %v5689_v55 = vadd.f32 1e-06, %v5595_v50  ;;  %v8520_v30 = vmul.f32 0.032258064, %v5539_v13 }
 0x672   :  { %v5597_v31 = vmul.f32 %v7152_v7, %v8456_v11  ;;  %7165 = vrsqrt.f32 %v8517_v43  ;;  %v5629_v53 = vand.u32 2147483648, %v8505_v36  ;;  %vm5647_vm8 = vcmp.eq.f32.partialorder %v8517_v43, inf }
 0x673   :  { %v5606_v12 = vsel %vm5605_vm11, %v8454_v0, %v5604_v27  ;;  %v5548_v15 = vpop.xlane.xlu1 %5547  ;;  %7167 = vrsqrt.f32 %v8520_v30  ;;  %vm5649_vm9 = vcmp.eq.f32.partialorder %v8517_v43, 0.0  ;;  %v5650_v41 = vand.u32 2147483648, %v8517_v43 }
 0x674   :  { %v5545_v29 = vpop.xlane.xlu0 %5544  ;;  %v7154_v9 = vpop.eup %7153  ;;  %v5609_v38 = vsel %vm5607_vm12, %v5608_v47, %v5606_v12  ;;  %v5599_v44 = vsel %vm5598_vm13, %v8456_v11, %v5597_v31  ;;  %7169 = vrcp.f32 %v5689_v55  ;;  %v8541_v16 = vmul.f32 0.032258064, %v5548_v15 }
 0x675   :  { %v5691_v37 = vadd.f32 1e-06, %v5609_v38  ;;  %v5602_v14 = vsel %vm5600_vm14, %v5601_v4, %v5599_v44  ;;  %v5618_v52 = vmul.f32 %v7154_v9, %v8492_v33  ;;  %v7156_v0 = vpop.eup %7155  ;;  %v8547_v11 = vmul.f32 0.032258064, %v5545_v29 }
 0x676   :  { %v5690_v19 = vadd.f32 1e-06, %v5602_v14  ;;  %v5611_v32 = vmul.f32 %v7156_v0, %v8494_v1  ;;  %vm5640_vm10 = vcmp.eq.f32.partialorder %v8520_v30, inf  ;;  %vm5642_vm11 = vcmp.eq.f32.partialorder %v8520_v30, 0.0 }
 0x677   :  { %7171 = vrcp.f32 %v5691_v37  ;;  %v5620_v23 = vsel %vm5619_vm15, %v8492_v33, %v5618_v52  ;;  %v5554_v40 = vpop.xlane.xlu1 %5553  ;;  %v5643_v50 = vand.u32 2147483648, %v8520_v30  ;;  %vm5661_vm12 = vcmp.eq.f32.partialorder %v8541_v16, inf }
 0x678   :  { %v5551_v8 = vpop.xlane.xlu0 %5550  ;;  %7173 = vrcp.f32 %v5690_v19  ;;  %v5623_v22 = vsel %vm5621_vm1, %v5622_v59, %v5620_v23  ;;  %v7158_v6 = vpop.eup %7157  ;;  %v5613_v42 = vsel %vm5612_vm2, %v8494_v1, %v5611_v32  ;;  %v8570_v4 = vmul.f32 0.032258064, %v5554_v40  ;;  %v8610_v32 = vld [vmem:[%s8877_s8] ss:$0 sm:$0xff] }
 0x679   :  { %v5693_v10 = vadd.f32 1e-06, %v5623_v22  ;;  %7175 = vrsqrt.f32 %v8541_v16  ;;  %v7160_v56 = vpop.eup %7159  ;;  %v5616_v33 = vsel %vm5614_vm3, %v5615_v20, %v5613_v42  ;;  %v5632_v58 = vmul.f32 %v7158_v6, %v8502_v18 }
 0x67a   :  { %7177 = vrsqrt.f32 %v8547_v11  ;;  %v7162_v51 = vpop.eup %7161  ;;  %v5692_v47 = vadd.f32 1e-06, %v5616_v33  ;;  %v5625_v5 = vmul.f32 %v7160_v56, %v8505_v36  ;;  %v8578_v7 = vmul.f32 0.032258064, %v5551_v8 }
 0x67b   :  { %v7164_v26 = vpop.eup %7163  ;;  %7179 = vrcp.f32 %v5693_v10  ;;  %v5634_v1 = vsel %vm5633_vm4, %v8502_v18, %v5632_v58  ;;  %vm5663_vm13 = vcmp.eq.f32.partialorder %v8541_v16, 0.0  ;;  %v5664_v15 = vand.u32 2147483648, %v8541_v16 }
 0x67c   :  { %v5557_v61 = vpop.xlane.xlu0 %5556  ;;  %v7166_v13 = vpop.eup %7165  ;;  %7181 = vrcp.f32 %v5692_v47  ;;  %v5637_v25 = vsel %vm5635_vm5, %v5636_v45, %v5634_v1  ;;  %v5627_v59 = vsel %vm5626_vm6, %v8505_v36, %v5625_v5  ;;  %vm5654_vm14 = vcmp.eq.f32.partialorder %v8547_v11, inf }
 0x67d   :  { %v7168_v27 = vpop.eup %7167  ;;  %v5695_v55 = vadd.f32 1e-06, %v5637_v25  ;;  %v5630_v31 = vsel %vm5628_vm7, %v5629_v53, %v5627_v59  ;;  %v5646_v12 = vmul.f32 %v7166_v13, %v8517_v43  ;;  %7183 = vrsqrt.f32 %v8570_v4  ;;  %v7208_v13 = vld [vmem:[%s8869_s0 + $0x8] sm:$0xff] }
 0x67e   :  { %v5694_v18 = vadd.f32 1e-06, %v5630_v31  ;;  %v5639_v20 = vmul.f32 %v7168_v27, %v8520_v30  ;;  %v8587_v29 = vmul.f32 0.032258064, %v5557_v61  ;;  %v7170_v9 = vpop.eup %7169  ;;  %vm5656_vm15 = vcmp.eq.f32.partialorder %v8547_v11, 0.0 }
 0x67f   :  { %7185 = vrcp.f32 %v5695_v55  ;;  %v5648_v36 = vsel %vm5647_vm8, %v8517_v43, %v5646_v12  ;;  %v5657_v37 = vand.u32 2147483648, %v8547_v11  ;;  %vm5675_vm1 = vcmp.eq.f32.partialorder %v8570_v4, inf  ;;  %v7210_v55 = vld [vmem:[%s8869_s0 + $0x18] sm:$0xff] }
 0x680   :  { %7187 = vrcp.f32 %v5694_v18  ;;  %v5651_v44 = vsel %vm5649_vm9, %v5650_v41, %v5648_v36  ;;  %v5641_v45 = vsel %vm5640_vm10, %v8520_v30, %v5639_v20  ;;  %vm5677_vm2 = vcmp.eq.f32.partialorder %v8570_v4, 0.0 }
 0x681   :  { %v7172_v38 = vpop.eup %7171  ;;  %v5697_v52 = vadd.f32 1e-06, %v5651_v44  ;;  %v5644_v0 = vsel %vm5642_vm11, %v5643_v50, %v5641_v45  ;;  %7189 = vrsqrt.f32 %v8578_v7  ;;  %v5678_v43 = vand.u32 2147483648, %v8570_v4 }
 0x682   :  { %v7174_v14 = vpop.eup %7173  ;;  %v5696_v23 = vadd.f32 1e-06, %v5644_v0  ;;  %7191 = vrsqrt.f32 %v8587_v29  ;;  %v5671_v22 = vand.u32 2147483648, %v8578_v7  ;;  %v5742_v53 = vmul.f32 %v7164_v26, %v8448_v46 }
 0x683   :  { %v7176_v19 = vpop.eup %7175  ;;  %7193 = vrcp.f32 %v5697_v52  ;;  %v5743_v10 = vmul.f32 %v7162_v51, %v8444_v2  ;;  %v5744_v42 = vmul.f32 %v7170_v9, %v8452_v60  ;;  %vm5668_vm3 = vcmp.eq.f32.partialorder %v8578_v7, inf }
 0x684   :  { %v7178_v8 = vpop.eup %7177  ;;  %v5660_v30 = vmul.f32 %v7176_v19, %v8541_v16  ;;  %7195 = vrcp.f32 %v5696_v23  ;;  %v5765_v33 = vadd.f32 %v8610_v32, %v5742_v53  ;;  %v5745_v58 = vmul.f32 %v7174_v14, %v8464_v17 }
 0x685   :  { %v5653_v6 = vmul.f32 %v7178_v8, %v8547_v11  ;;  %v7180_v40 = vpop.eup %7179  ;;  %v5746_v46 = vmul.f32 %v7172_v38, %v8460_v48  ;;  %vm5670_vm4 = vcmp.eq.f32.partialorder %v8578_v7, 0.0  ;;  %v5766_v60 = vadd.f32 %v8610_v32, %v5743_v10  ;;  %v7207_v48 = vld [vmem:[%s8869_s0] sm:$0xff] }
 0x686   :  { %v5662_v56 = vsel %vm5661_vm12, %v8541_v16, %v5660_v30  ;;  %v7182_v41 = vpop.eup %7181  ;;  %v5767_v51 = vadd.f32 %v8610_v32, %v5744_v42  ;;  %v8638_v16 = vadd.f32 %v7207_v48, %v5765_v33  ;;  %v5768_v1 = vadd.f32 %v8610_v32, %v5745_v58  ;;  %v7212_v30 = vld [vmem:[%s8869_s0 + $0x28] sm:$0xff] }
 0x687   :  { %v5665_v47 = vsel %vm5663_vm13, %v5664_v15, %v5662_v56  ;;  %v5655_v2 = vsel %vm5654_vm14, %v8547_v11, %v5653_v6  ;;  %v7184_v5 = vpop.eup %7183  ;;  %v8645_v25 = vadd.f32 %v7208_v13, %v5766_v60  ;;  %v7209_v11 = vld [vmem:[%s8869_s0 + $0x10] sm:$0xff]  ;;  %v5769_v12 = vadd.f32 %v8610_v32, %v5746_v46 }
 0x688   :  { %v5699_v26 = vadd.f32 1e-06, %v5665_v47  ;;  %v5658_v17 = vsel %vm5656_vm15, %v5657_v37, %v5655_v2  ;;  %v5674_v61 = vmul.f32 %v7184_v5, %v8570_v4  ;;  %v8650_v59 = vadd.f32 %v7209_v11, %v5767_v51  ;;  %7023 = vmatprep.mubr.msk.f32.mxu1 %vm147_vm0, %v8638_v16  ;;  %v7214_v47 = vld [vmem:[%s8869_s0 + $0x38] sm:$0xff] }
 0x689   :  { %v5698_v50 = vadd.f32 1e-06, %v5658_v17  ;;  %v7186_v27 = vpop.eup %7185  ;;  %v8657_v31 = vadd.f32 %v7210_v55, %v5768_v1  ;;  %v5747_v18 = vmul.f32 %v7182_v41, %v8472_v57  ;;  %7024 = vmatmul.mubr.msk.f32.vlgmr.msra.gmra.mrb[88].mxu1 %vm147_vm0, %v8645_v25  ;;  %v5748_v9 = vmul.f32 %v7180_v40, %v8468_v28  ;;  %v7211_v57 = vld [vmem:[%s8869_s0 + $0x20] sm:$0xff]  ;;  %v7213_v40 = vld [vmem:[%s8869_s0 + $0x30] sm:$0xff] }
 0x68a   :  { %7197 = vrcp.f32 %v5699_v26  ;;  %v7188_v20 = vpop.eup %7187  ;;  %v5676_v15 = vsel %vm5675_vm1, %v8570_v4, %v5674_v61  ;;  %v5750_v36 = vmul.f32 %v7186_v27, %v8476_v62  ;;  %7026 = vmatprep.mubr.msk.f32.mxu1 %vm147_vm0, %v8650_v59  ;;  %v8675_v45 = vadd.f32 %v7211_v57, %v5769_v12 }
 0x68b   :  { %7199 = vrcp.f32 %v5698_v50  ;;  %v7190_v38 = vpop.eup %7189  ;;  %v5679_v44 = vsel %vm5677_vm2, %v5678_v43, %v5676_v15  ;;  %v5770_v37 = vadd.f32 %v8610_v32, %v5747_v18  ;;  %v5749_v14 = vmul.f32 %v7188_v20, %v8480_v3  ;;  %v7217_v50 = vld [vmem:[%s8869_s0 + $0x50] sm:$0xff]  ;;  %v7219_v20 = vld [vmem:[%s8869_s0 + $0x60] sm:$0xff] }
 0x68c   :  { %v7192_v28 = vpop.eup %7191  ;;  %v5701_v52 = vadd.f32 1e-06, %v5679_v44  ;;  %v5667_v62 = vmul.f32 %v7190_v38, %v8578_v7  ;;  %vm5682_vm5 = vcmp.eq.f32.partialorder %v8587_v29, inf  ;;  %v5771_v4 = vadd.f32 %v8610_v32, %v5748_v9 }
 0x68d   :  { %v7194_v0 = vpop.eup %7193  ;;  %v5681_v19 = vmul.f32 %v7192_v28, %v8587_v29  ;;  %vm5684_vm6 = vcmp.eq.f32.partialorder %v8587_v29, 0.0  ;;  %v5685_v23 = vand.u32 2147483648, %v8587_v29  ;;  %v5773_v43 = vadd.f32 %v8610_v32, %v5750_v36  ;;  %7027 = vmatmul.mubr.msk.f32.gmra.mrb[90].mxu1 %vm147_vm0, %v8657_v31 }
 0x68e   :  { %v7196_v8 = vpop.eup %7195  ;;  %7201 = vrcp.f32 %v5701_v52  ;;  %v5669_v3 = vsel %vm5668_vm3, %v8578_v7, %v5667_v62  ;;  %v8694_v53 = vadd.f32 %v7212_v30, %v5770_v37  ;;  %v5772_v6 = vadd.f32 %v8610_v32, %v5749_v14  ;;  %7029 = vmatprep.mubr.msk.f32.mxu1 %vm147_vm0, %v8675_v45  ;;  %v7220_v14 = vld [vmem:[%s8869_s0 + $0x70] sm:$0xff]  ;;  %v7222_v62 = vld [vmem:[%s8869_s0 + $0x78] sm:$0xff] }
 0x68f   :  { %v5672_v10 = vsel %vm5670_vm4, %v5671_v22, %v5669_v3  ;;  %v5683_v42 = vsel %vm5682_vm5, %v8587_v29, %v5681_v19  ;;  %v8707_v56 = vadd.f32 %v7213_v40, %v5771_v4  ;;  %v5751_v33 = vmul.f32 %v7196_v8, %v8489_v24 }
 0x690   :  { %v5700_v58 = vadd.f32 1e-06, %v5672_v10  ;;  %v5686_v46 = vsel %vm5684_vm6, %v5685_v23, %v5683_v42  ;;  %v5752_v7 = vmul.f32 %v7194_v0, %v8484_v54  ;;  %v5738_v41 = vmul.f32 %v8440_v21, %v8388_v34  ;;  %v7215_v34 = vld [vmem:[%s8869_s0 + $0x40] sm:$0xff]  ;;  %v6020_v0 = vld [vmem:[%s8880_s11 + $0x18] sm:$0xff] }
 0x691   :  { %v5702_v22 = vadd.f32 1e-06, %v5686_v46  ;;  %7030 = vmatmul.mubr.msk.f32.gmra.mrb[92].mxu1 %vm147_vm0, %v8694_v53  ;;  %v8720_v2 = vadd.f32 %v7214_v47, %v5772_v6  ;;  %v5774_v24 = vadd.f32 %v8610_v32, %v5751_v33  ;;  %v5737_v54 = vmul.f32 %v8440_v21, %v8391_v63  ;;  %v7216_v63 = vld [vmem:[%s8869_s0 + $0x48] sm:$0xff]  ;;  %v6353_v23 = vld [vmem:[%s8879_s10] ss:$0 sm:$0xff] }
 0x692   :  { %7203 = vrcp.f32 %v5700_v58  ;;  %7032 = vmatprep.mubr.msk.f32.mxu1 %vm147_vm0, %v8707_v56  ;;  %v8730_v60 = vadd.f32 %v7215_v34, %v5773_v43  ;;  %v5775_v51 = vadd.f32 %v8610_v32, %v5752_v7  ;;  %v5740_v1 = vmul.f32 %v8440_v21, %v8400_v49  ;;  %v7218_v49 = vld [vmem:[%s8869_s0 + $0x58] sm:$0xff] }
 0x693   :  { %7205 = vrcp.f32 %v5702_v22  ;;  %v8738_v48 = vadd.f32 %v7216_v63, %v5774_v24  ;;  %v5739_v18 = vmul.f32 %v8440_v21, %v8403_v35  ;;  %v5741_v36 = vmul.f32 %v8440_v21, %v8412_v39  ;;  %v7221_v21 = vld [vmem:[%s8869_s0 + $0x68] sm:$0xff] }
 0x694   :  { %v7198_v29 = vpop.eup %7197  ;;  %v8747_v61 = vadd.f32 %v7217_v50, %v5775_v51 }
 0x695   :  { %v7200_v5 = vpop.eup %7199  ;;  %v5754_v26 = vmul.f32 %v7198_v29, %v5738_v41  ;;  %7033 = vmatmul.mubr.msk.f32.gmra.mrb[94].mxu1 %vm147_vm0, %v8720_v2 }
 0x696   :  { %v5753_v17 = vmul.f32 %v7200_v5, %v5737_v54  ;;  %7035 = vmatprep.mubr.msk.f32.mxu1 %vm147_vm0, %v8730_v60 }
 0x697   :  { %v5777_v11 = vadd.f32 %v8610_v32, %v5754_v26 }
 0x698   :  { %v5776_v13 = vadd.f32 %v8610_v32, %v5753_v17  ;;  %v7202_v27 = vpop.eup %7201 }
 0x699   :  { %v5756_v55 = vmul.f32 %v7202_v27, %v5740_v1  ;;  %7036 = vmatmul.mubr.msk.f32.gmra.mrb[96].mxu1 %vm147_vm0, %v8738_v48  ;;  %v8765_v15 = vadd.f32 %v7219_v20, %v5777_v11 }
 0x69a   :  { %v8756_v12 = vadd.f32 %v7218_v49, %v5776_v13  ;;  %7038 = vmatprep.mubr.msk.f32.mxu1 %vm147_vm0, %v8747_v61 }
 0x69b   :  { %v5779_v38 = vadd.f32 %v8610_v32, %v5756_v55 }
 0x69c   :  { %v7204_v9 = vpop.eup %7203 }
 0x69d   :  { %v7206_v44 = vpop.eup %7205  ;;  %v5755_v57 = vmul.f32 %v7204_v9, %v5739_v18  ;;  %7039 = vmatmul.mubr.msk.f32.gmra.mrb[98].mxu1 %vm147_vm0, %v8756_v12  ;;  %v8778_v28 = vadd.f32 %v7220_v14, %v5779_v38 }
 0x69e   :  { %v5757_v35 = vmul.f32 %v7206_v44, %v5741_v36  ;;  %7041 = vmatprep.mubr.msk.f32.mxu1 %vm147_vm0, %v8765_v15 }
 0x69f   :  { %v5778_v37 = vadd.f32 %v8610_v32, %v5755_v57 }
 0x6a0   :  { %v5780_v39 = vadd.f32 %v8610_v32, %v5757_v35  ;;  %v6019_v32 = vld [vmem:[%s8880_s11 + $0x10] sm:$0xff] }
 0x6a1   :  { %v8784_v52 = vadd.f32 %v7221_v21, %v5778_v37  ;;  %v7131_v19 = vpack.c.bf16 %v6020_v0, %v6019_v32 }
 0x6a2   :  { %v8791_v4 = vadd.f32 %v7222_v62, %v5780_v39 }
 0x6a3   :  { %7042 = vmatmul.mubr.msk.f32.gmra.mrb[100].mxu1 %vm147_vm0, %v8784_v52  ;;  %7132 = vmatprep.subr.bf16.mxu0 %v7131_v19 }
 0x6a4   :  { %7044 = vmatprep.mubr.msk.f32.mxu1 %vm147_vm0, %v8778_v28  ;;  %7134 = vmatpush3.bf16.msra.mxu0 %v7131_v19 }
 0x6a7   :  { %7045 = vmatmul.mubr.msk.f32.gmra.mrb[102].mxu1 %vm147_vm0, %v8791_v4 }
 0x75c   :  { %v7025_v43 = vpop.f32.mrb[88].mxu1 }
 0x75d   :  { %v5928_v8 = vadd.f32 %v7025_v43, %v6353_v23  ;;  %v5922_v3 = vpop.f32.mrb[89].mxu1 }
 0x75e   :  { %v5923_v30 = vadd.f32 %v6353_v23, %v5922_v3 }
 0x75f   :  { %v6002_v42 = vmax.f32 %v5928_v8, 0.0  ;;  %v6370_v8 = vld [vmem:[%s8881_s12] ss:$0 sm:$0xff]  ;;  %s7252_s12 = smov [#allocation2]  }
 0x760   :  { %v6001_v6 = vmax.f32 %v5923_v30, 0.0  ;;  %v7028_v10 = vpop.f32.mrb[90].mxu1  ;;  %s6258_s21 = sshll.u32 %s7252_s12, 4  ;;  %s6259_s21 = int_to_ptr.vmem [resolvable:$true] %s6258_s21 }
 0x761   :  { %v5938_v40 = vadd.f32 %v7028_v10, %v6353_v23  ;;  %v5932_v33 = vpop.f32.mrb[91].mxu1  ;;  %s7223_s3 = scalar_lea.vmem %s6259_s21, 2048  ;;  %p7228_p1 = scmp.lt.s32.totalorder %s6259_s21, %s6259_s21 }
 0x762   :  { %7055 = vmatprep.mubr.msk.f32.mxu0 %vm147_vm0, %v6001_v6  ;;  %v5933_v58 = vadd.f32 %v6353_v23, %v5932_v33  ;;  %p7224_p0 = scmp.ne.s32.totalorder %s6259_s21, %s7223_s3  ;;  %p7229_p2 = scmp.lt.s32.totalorder %s7223_s3, %s7223_s3 }
 0x763   :  { %7056 = vmatmul.mubr.msk.f32.vlgmr.msra.gmra.mrb[72].mxu0 %vm147_vm0, %v6002_v42  ;;  %v6004_v22 = vmax.f32 %v5938_v40, 0.0 }
 0x764   :  { %v6003_v46 = vmax.f32 %v5933_v58, 0.0  ;;  %v7031_v7 = vpop.f32.mrb[92].mxu1  ;;  %p7230_p3 = por %p7229_p2, %p7228_p1 }
 0x765   :  { %v5948_v41 = vadd.f32 %v7031_v7, %v6353_v23  ;;  %v5942_v47 = vpop.f32.mrb[93].mxu1 }
 0x766   :  { %v5943_v24 = vadd.f32 %v6353_v23, %v5942_v47  ;;  %7058 = vmatprep.mubr.msk.f32.mxu0 %vm147_vm0, %v6003_v46  ;;  %p7231_p4 = pnand %p7230_p3, %p7224_p0 }
 0x767   :  { %7059 = vmatmul.mubr.msk.f32.gmra.mrb[74].mxu0 %vm147_vm0, %v6004_v22  ;;  %v6006_v34 = vmax.f32 %v5948_v41, 0.0 }
 0x768   :  { %v6005_v29 = vmax.f32 %v5943_v24, 0.0  ;;  %v7034_v54 = vpop.f32.mrb[94].mxu1 }
 0x769   :  { %v5958_v51 = vadd.f32 %v7034_v54, %v6353_v23  ;;  %v5952_v5 = vpop.f32.mrb[95].mxu1 }
 0x76a   :  { %v5953_v26 = vadd.f32 %v6353_v23, %v5952_v5  ;;  %7061 = vmatprep.mubr.msk.f32.mxu0 %vm147_vm0, %v6005_v29 }
 0x76b   :  { %7062 = vmatmul.mubr.msk.f32.gmra.mrb[76].mxu0 %vm147_vm0, %v6006_v34  ;;  %v6008_v1 = vmax.f32 %v5958_v51, 0.0 }
 0x76c   :  { %v6007_v17 = vmax.f32 %v5953_v26, 0.0  ;;  %v7037_v63 = vpop.f32.mrb[96].mxu1 }
 0x76d   :  { %v5968_v50 = vadd.f32 %v7037_v63, %v6353_v23  ;;  %v5962_v13 = vpop.f32.mrb[97].mxu1 }
 0x76e   :  { %v5963_v11 = vadd.f32 %v6353_v23, %v5962_v13  ;;  %7064 = vmatprep.mubr.msk.f32.mxu0 %vm147_vm0, %v6007_v17 }
 0x76f   :  { %7065 = vmatmul.mubr.msk.f32.gmra.mrb[78].mxu0 %vm147_vm0, %v6008_v1  ;;  %v6010_v49 = vmax.f32 %v5968_v50, 0.0 }
 0x770   :  { %v6009_v27 = vmax.f32 %v5963_v11, 0.0  ;;  %v7040_v55 = vpop.f32.mrb[98].mxu1 }
 0x771   :  { %v5978_v18 = vadd.f32 %v7040_v55, %v6353_v23  ;;  %v5972_v20 = vpop.f32.mrb[99].mxu1 }
 0x772   :  { %v5973_v9 = vadd.f32 %v6353_v23, %v5972_v20  ;;  %7067 = vmatprep.mubr.msk.f32.mxu0 %vm147_vm0, %v6009_v27 }
 0x773   :  { %7068 = vmatmul.mubr.msk.f32.gmra.mrb[80].mxu0 %vm147_vm0, %v6010_v49  ;;  %v6012_v38 = vmax.f32 %v5978_v18, 0.0 }
 0x774   :  { %v6011_v36 = vmax.f32 %v5973_v9, 0.0 }
 0x776   :  { %v7043_v44 = vpop.f32.mrb[100].mxu1  ;;  %7070 = vmatprep.mubr.msk.f32.mxu0 %vm147_vm0, %v6011_v36 }
 0x777   :  { %v5988_v57 = vadd.f32 %v7043_v44, %v6353_v23  ;;  %v5982_v35 = vpop.f32.mrb[101].mxu1  ;;  %7071 = vmatmul.mubr.msk.f32.gmra.mrb[82].mxu0 %vm147_vm0, %v6012_v38 }
 0x778   :  { %v5983_v37 = vadd.f32 %v6353_v23, %v5982_v35 }
 0x779   :  { %v6014_v21 = vmax.f32 %v5988_v57, 0.0 }
 0x77a   :  { %v6013_v14 = vmax.f32 %v5983_v37, 0.0  ;;  %v7046_v39 = vpop.f32.mrb[102].mxu1 }
 0x77b   :  { %v5998_v62 = vadd.f32 %v7046_v39, %v6353_v23  ;;  %v5992_v32 = vpop.f32.mrb[103].mxu1 }
 0x77c   :  { %v5993_v0 = vadd.f32 %v6353_v23, %v5992_v32  ;;  %7073 = vmatprep.mubr.msk.f32.mxu0 %vm147_vm0, %v6013_v14 }
 0x77d   :  { %7074 = vmatmul.mubr.msk.f32.gmra.mrb[84].mxu0 %vm147_vm0, %v6014_v21  ;;  %v6016_v43 = vmax.f32 %v5998_v62, 0.0 }
 0x77e   :  { %v6015_v19 = vmax.f32 %v5993_v0, 0.0 }
 0x780   :  { %7076 = vmatprep.mubr.msk.f32.mxu0 %vm147_vm0, %v6015_v19 }
 0x781   :  { %7077 = vmatmul.mubr.msk.f32.gmra.mrb[86].mxu0 %vm147_vm0, %v6016_v43 }
 0x836   :  { %v7057_v3 = vpop.f32.mrb[72].mxu0 }
 0x837   :  { %v6148_v30 = vadd.f32 %v7057_v3, %v6370_v8  ;;  %v6142_v6 = vpop.f32.mrb[73].mxu0 }
 0x838   :  { %v6143_v10 = vadd.f32 %v6370_v8, %v6142_v6 }
 0x839   :  { %v6222_v23 = vadd.f32 %v6148_v30, %v8645_v25 }
 0x83a   :  { %v6221_v42 = vadd.f32 %v6143_v10, %v8638_v16  ;;  %v7060_v40 = vpop.f32.mrb[74].mxu0 }
 0x83b   :  { %6238 = vst.msk [vmem:[#allocation2 + $0x8] sm:$0xff] %vm147_vm0, %v6222_v23  ;;  %v6158_v33 = vadd.f32 %v7060_v40, %v6370_v8  ;;  %v6152_v58 = vpop.f32.mrb[75].mxu0 }
 0x83c   :  { %6237 = vst.msk [vmem:[#allocation2] sm:$0xff] %vm147_vm0, %v6221_v42  ;;  %v6153_v46 = vadd.f32 %v6370_v8, %v6152_v58 }
 0x83d   :  { %v6224_v7 = vadd.f32 %v6158_v33, %v8657_v31 }
 0x83e   :  { %v6223_v22 = vadd.f32 %v6153_v46, %v8650_v59  ;;  %v7063_v41 = vpop.f32.mrb[76].mxu0 }
 0x83f   :  { %6240 = vst.msk [vmem:[#allocation2 + $0x18] sm:$0xff] %vm147_vm0, %v6224_v7  ;;  %v6168_v47 = vadd.f32 %v7063_v41, %v6370_v8  ;;  %v6162_v24 = vpop.f32.mrb[77].mxu0 }
 0x840   :  { %6239 = vst.msk [vmem:[#allocation2 + $0x10] sm:$0xff] %vm147_vm0, %v6223_v22  ;;  %v6163_v16 = vadd.f32 %v6370_v8, %v6162_v24 }
 0x841   :  { %v6226_v25 = vadd.f32 %v6168_v47, %v8694_v53 }
 0x842   :  { %v6225_v29 = vadd.f32 %v6163_v16, %v8675_v45  ;;  %v7066_v54 = vpop.f32.mrb[78].mxu0 }
 0x843   :  { %6242 = vst.msk [vmem:[#allocation2 + $0x28] sm:$0xff] %vm147_vm0, %v6226_v25  ;;  %v6178_v34 = vadd.f32 %v7066_v54, %v6370_v8  ;;  %v6172_v51 = vpop.f32.mrb[79].mxu0 }
 0x844   :  { %6241 = vst.msk [vmem:[#allocation2 + $0x20] sm:$0xff] %vm147_vm0, %v6225_v29  ;;  %v6173_v59 = vadd.f32 %v6370_v8, %v6172_v51 }
 0x845   :  { %v6228_v31 = vadd.f32 %v6178_v34, %v8720_v2 }
 0x846   :  { %v6227_v5 = vadd.f32 %v6173_v59, %v8707_v56  ;;  %v7069_v26 = vpop.f32.mrb[80].mxu0 }
 0x847   :  { %6244 = vst.msk [vmem:[#allocation2 + $0x38] sm:$0xff] %vm147_vm0, %v6228_v31  ;;  %v6188_v17 = vadd.f32 %v7069_v26, %v6370_v8  ;;  %v6182_v63 = vpop.f32.mrb[81].mxu0 }
 0x848   :  { %6243 = vst.msk [vmem:[#allocation2 + $0x30] sm:$0xff] %vm147_vm0, %v6227_v5  ;;  %v6183_v45 = vadd.f32 %v6370_v8, %v6182_v63 }
 0x849   :  { %v6230_v53 = vadd.f32 %v6188_v17, %v8738_v48 }
 0x84a   :  { %v6229_v1 = vadd.f32 %v6183_v45, %v8730_v60  ;;  %v7072_v50 = vpop.f32.mrb[82].mxu0 }
 0x84b   :  { %6246 = vst.msk [vmem:[#allocation2 + $0x48] sm:$0xff] %vm147_vm0, %v6230_v53  ;;  %v6198_v13 = vadd.f32 %v7072_v50, %v6370_v8  ;;  %v6192_v11 = vpop.f32.mrb[83].mxu0 }
 0x84c   :  { %6245 = vst.msk [vmem:[#allocation2 + $0x40] sm:$0xff] %vm147_vm0, %v6229_v1  ;;  %v6193_v56 = vadd.f32 %v6370_v8, %v6192_v11 }
 0x84d   :  { %v6232_v2 = vadd.f32 %v6198_v13, %v8756_v12 }
 0x84e   :  { %v6231_v27 = vadd.f32 %v6193_v56, %v8747_v61 }
 0x84f   :  { %6248 = vst.msk [vmem:[#allocation2 + $0x58] sm:$0xff] %vm147_vm0, %v6232_v2 }
 0x850   :  { %v7075_v55 = vpop.f32.mrb[84].mxu0  ;;  %6247 = vst.msk [vmem:[#allocation2 + $0x50] sm:$0xff] %vm147_vm0, %v6231_v27 }
 0x851   :  { %v6208_v48 = vadd.f32 %v7075_v55, %v6370_v8  ;;  %v6202_v49 = vpop.f32.mrb[85].mxu0 }
 0x852   :  { %v6203_v60 = vadd.f32 %v6370_v8, %v6202_v49 }
 0x853   :  { %v6234_v18 = vadd.f32 %v6208_v48, %v8784_v52 }
 0x854   :  { %v6233_v20 = vadd.f32 %v6203_v60, %v8765_v15  ;;  %v7078_v9 = vpop.f32.mrb[86].mxu0 }
 0x855   :  { %6250 = vst.msk [vmem:[#allocation2 + $0x68] sm:$0xff] %vm147_vm0, %v6234_v18  ;;  %v6218_v36 = vadd.f32 %v7078_v9, %v6370_v8  ;;  %v6212_v38 = vpop.f32.mrb[87].mxu0 }
 0x856   :  { %6249 = vst.msk [vmem:[#allocation2 + $0x60] sm:$0xff] %vm147_vm0, %v6233_v20  ;;  %v6213_v61 = vadd.f32 %v6370_v8, %v6212_v38 }
 0x857   :  { %v6236_v12 = vadd.f32 %v6218_v36, %v8791_v4 }
 0x858   :  { %v6235_v44 = vadd.f32 %v6213_v61, %v8778_v28 }
 0x859   :  { %6252 = vst.msk [vmem:[#allocation2 + $0x78] sm:$0xff] %vm147_vm0, %v6236_v12 }
 0x85a   :  { %6251 = vst.msk [vmem:[#allocation2 + $0x70] sm:$0xff] %vm147_vm0, %v6235_v44 }
 0x85b   :  { %7234 = shalt.err (!%p7231_p4)
}
 0x85c   :  { %s7235_s23 = scalar_lea.hbm %s8882_s13, 2048 }
 0x85d   :  { %p7236_p5 = scmp.ne.s32.totalorder %s8882_s13, %s7235_s23  ;;  %p7239_p6 = scmp.lt.u32.totalorder %s7235_s23, %s8882_s13 }
 0x85f   :  { %p7241_p7 = pnand %p7239_p6, %p7236_p5 }
 0x861   :  { %7244 = shalt.err (!%p7241_p7)
}
 0x862   :  { %s7253_s27 = smov 128   ;;  %s7254_s28 = smov 8  }
 0x863   :  { %6264 = dma.vmem_to_hbm [thread:$0]  %s6259_s21, 2048, %s8882_s13, [#allocation3], %s7253_s27, %s7253_s27, %s7254_s28  }
 0x864   :  { %7245 = dma.done.wait [#allocation3], 2048  }
 0x865   :  { %7246 = vsyncadd [#allocation3], 4294965248 }
 0x866   :  { %6268 = vsyncpa [#allocation3], 1 }

</bundles_post_ra>
